<compile_context>
chip_gen: v7x
topology: tpu7x:2x2x1
jax: 0.10.0
libtpu: 0.0.40
codegen_flags: <defaults>
</compile_context>

<pallas_src>
import jax
import jax.numpy as jnp
from jax.experimental import pallas as pl


# ----------------------------- Config (synthetic) ---------------------------
class Config:
    conv1_num_filter = 8
    conv1_size = 3
    conv2_num_filter = 16
    conv2_size = 3
    conv3_num_filter = 32
    conv3_size = 3
    maxpool_size = 2
    fc1_size = 64
    fc2_size = 32


# ----------------------- Fused conv + ReLU + maxpool stage -------------------
def _conv_relu_pool_kernel(cols_ref, w_ref, b_ref, o_ref):
    """cols_ref: [4, M, K]  (one im2col matrix per 2x2 pool-window corner)
       w_ref:    [K, Cout]
       b_ref:    [1, Cout]
       o_ref:    [M, Cout]  (pooled, channel-last output)"""
    w = w_ref[...]
    m00 = jnp.dot(cols_ref[0], w, preferred_element_type=jnp.float32)
    m01 = jnp.dot(cols_ref[1], w, preferred_element_type=jnp.float32)
    m10 = jnp.dot(cols_ref[2], w, preferred_element_type=jnp.float32)
    m11 = jnp.dot(cols_ref[3], w, preferred_element_type=jnp.float32)
    y = jnp.maximum(jnp.maximum(m00, m01), jnp.maximum(m10, m11))
    o_ref[...] = jnp.maximum(y + b_ref[...], 0.0).astype(o_ref.dtype)


def _pooled_im2col(x_nhwc, k):
    """JAX glue: [B,H,W,C] -> ([4, B*PH*PW, C*k*k], PH, PW).

    Corner (r, s) covers conv-output positions (2*ph + r, 2*pw + s), so the
    kernel's elementwise max over the 4 corners IS the 2x2/stride-2 floor-mode
    max pool.  Column order is (c, di, dj) with dj minor, matching
    w.reshape(Cout, Cin*k*k)."""
    B, H, W, C = x_nhwc.shape
    OH, OW = H - k + 1, W - k + 1
    PH, PW = OH // 2, OW // 2
    corners = []
    for r in range(2):
        for s in range(2):
            taps = [
                x_nhwc[:, r + di: r + di + 2 * PH: 2,
                       s + dj: s + dj + 2 * PW: 2, :]
                for di in range(k) for dj in range(k)
            ]
            t = jnp.stack(taps, axis=-1)                  # [B, PH, PW, C, k*k]
            corners.append(t.reshape(B * PH * PW, C * k * k))
    return jnp.stack(corners, axis=0), PH, PW             # [4, M, K]


def conv_relu_pool(x_nhwc, w, b):
    """x: [B,H,W,Cin] (NHWC), w: [Cout,Cin,k,k] (torch OIHW), b: [Cout]
    -> pooled activation [B, PH, PW, Cout] (NHWC, lanes = Cout)."""
    B, H, W, Cin = x_nhwc.shape
    Cout, _, k, _ = w.shape
    cols, PH, PW = _pooled_im2col(x_nhwc, k)
    M, K = cols.shape[1], cols.shape[2]
    wmat = w.reshape(Cout, Cin * k * k).T                  # [K, Cout]
    out = pl.pallas_call(
        _conv_relu_pool_kernel,
        out_shape=jax.ShapeDtypeStruct((M, Cout), jnp.float32),
        in_specs=[
            pl.BlockSpec((4, M, K), lambda: (0, 0, 0)),
            pl.BlockSpec((K, Cout), lambda: (0, 0)),
            pl.BlockSpec((1, Cout), lambda: (0, 0)),
        ],
        out_specs=pl.BlockSpec((M, Cout), lambda: (0, 0)),
    )(cols, wmat, b.reshape(1, Cout))
    return out.reshape(B, PH, PW, Cout)


# ----------------------------- Fused 3-layer MLP -----------------------------
def _mlp_kernel(x_ref, w1_ref, b1_ref, w2_ref, b2_ref, w3_ref, b3_ref, o_ref):
    h = jnp.dot(x_ref[...], w1_ref[...], preferred_element_type=jnp.float32)
    h = jnp.maximum(h + b1_ref[...], 0.0)
    h = jnp.dot(h, w2_ref[...], preferred_element_type=jnp.float32)
    h = jnp.maximum(h + b2_ref[...], 0.0)
    h = jnp.dot(h, w3_ref[...], preferred_element_type=jnp.float32)
    o_ref[...] = (h + b3_ref[...]).astype(o_ref.dtype)


def mlp(x, p):
    """Fused fc1(+ReLU) -> fc2(+ReLU) -> fc3; intermediates stay on-chip."""
    B, D = x.shape
    N1 = p["f1w"].shape[1]
    N2 = p["f2w"].shape[1]
    N3 = p["f3w"].shape[1]

    def full(*shape):
        return pl.BlockSpec(shape, lambda: (0,) * len(shape))

    return pl.pallas_call(
        _mlp_kernel,
        out_shape=jax.ShapeDtypeStruct((B, N3), jnp.float32),
        in_specs=[
            full(B, D),
            full(D, N1), full(1, N1),
            full(N1, N2), full(1, N2),
            full(N2, N3), full(1, N3),
        ],
        out_specs=full(B, N3),
    )(x,
      p["f1w"], p["f1b"].reshape(1, N1),
      p["f2w"], p["f2b"].reshape(1, N2),
      p["f3w"], p["f3b"].reshape(1, N3))


# ----------------------------- Parameter init --------------------------------
def _init_conv(key, cout, cin, k):
    fan_in = cin * k * k
    bound = 1.0 / (fan_in ** 0.5)
    kw, kb = jax.random.split(key)
    w = jax.random.uniform(kw, (cout, cin, k, k), jnp.float32, -bound, bound)
    b = jax.random.uniform(kb, (cout,), jnp.float32, -bound, bound)
    return w, b


def _init_fc(key, in_f, out_f):
    bound = 1.0 / (in_f ** 0.5)
    kw, kb = jax.random.split(key)
    w = jax.random.uniform(kw, (in_f, out_f), jnp.float32, -bound, bound)
    b = jax.random.uniform(kb, (out_f,), jnp.float32, -bound, bound)
    return w, b


def init_params(key, input_size, output_size):
    ks = jax.random.split(key, 6)
    p = {}
    p["c1w"], p["c1b"] = _init_conv(ks[0], Config.conv1_num_filter, 1, Config.conv1_size)
    p["c2w"], p["c2b"] = _init_conv(ks[1], Config.conv2_num_filter,
                                    Config.conv1_num_filter, Config.conv2_size)
    p["c3w"], p["c3b"] = _init_conv(ks[2], Config.conv3_num_filter,
                                    Config.conv2_num_filter, Config.conv3_size)
    p["f1w"], p["f1b"] = _init_fc(ks[3], input_size, Config.fc1_size)
    p["f2w"], p["f2b"] = _init_fc(ks[4], Config.fc1_size, Config.fc2_size)
    p["f3w"], p["f3b"] = _init_fc(ks[5], Config.fc2_size, output_size)
    return p


# ----------------------------- Forward pass ----------------------------------
def cnn_forward(params, x, input_size):
    # torch: x.unsqueeze(1) -> NCHW [B,1,H,W]; internally we run NHWC.
    x = x[:, :, :, None]                                   # [B, H, W, 1]
    x = conv_relu_pool(x, params["c1w"], params["c1b"])
    x = conv_relu_pool(x, params["c2w"], params["c2b"])
    x = conv_relu_pool(x, params["c3w"], params["c3b"])
    # Reproduce torch's NCHW-contiguous .view(-1, input_size).
    feat = x.transpose(0, 3, 1, 2).reshape(-1, input_size)
    return mlp(feat, params)


# ----------------------------- Pure-JAX reference ----------------------------
def cnn_reference(params, x, input_size):
    x = x[:, None, :, :]

    def conv(x, w, b):
        y = jax.lax.conv_general_dilated(x, w, (1, 1), "VALID",
                                         dimension_numbers=("NCHW", "OIHW", "NCHW"))
        return jax.nn.relu(y + b[None, :, None, None])

    def pool(x):
        B, C, H, W = x.shape
        OH, OW = H // 2, W // 2
        xc = x[:, :, : OH * 2, : OW * 2].reshape(B, C, OH, 2, OW, 2)
        return xc.max(axis=(3, 5))

    x = pool(conv(x, params["c1w"], params["c1b"]))
    x = pool(conv(x, params["c2w"], params["c2b"]))
    x = pool(conv(x, params["c3w"], params["c3b"]))
    out = x.reshape(-1, input_size)
    out = jax.nn.relu(out @ params["f1w"] + params["f1b"])
    out = jax.nn.relu(out @ params["f2w"] + params["f2b"])
    return out @ params["f3w"] + params["f3b"]


# ----------------------------- Main -------------------------------------------
if __name__ == "__main__":
    B, H, W = 2, 28, 28
    # 28 -conv3-> 26 -pool-> 13 -conv3-> 11 -pool-> 5 -conv3-> 3 -pool-> 1
    input_size = Config.conv3_num_filter * 1 * 1   # 32 = flattened feature size
    output_size = 10

    key = jax.random.PRNGKey(0)
    kx, kp = jax.random.split(key)
    x = jax.random.normal(kx, (B, H, W), jnp.float32)
    params = init_params(kp, input_size, output_size)

    out = cnn_forward(params, x, input_size)
    out = jax.block_until_ready(out)

    ref = jax.block_until_ready(cnn_reference(params, x, input_size))
    assert out.shape == (B, output_size), out.shape
    assert bool(jnp.isfinite(out).all())
    assert bool(jnp.allclose(out, ref, rtol=1e-2, atol=1e-2)), \
        f"max abs err {float(jnp.max(jnp.abs(out - ref)))}"

    print("KERNEL_OK")
</pallas_src>

<mosaic_0001>
module attributes {stable_mosaic.version = 11 : i64} {
  func.func @_conv_relu_pool_kernel(%arg0: memref<4x338x9xf32, #tpu.memory_space<vmem>>, %arg1: memref<9x8xf32, #tpu.memory_space<vmem>>, %arg2: memref<1x8xf32, #tpu.memory_space<vmem>>, %arg3: memref<338x8xf32, #tpu.memory_space<vmem>>) attributes {dimension_semantics = [], scalar_prefetch = 0 : i64, scratch_operands = 0 : i64, tpu.core_type = #tpu.core_type<tc>} {
    %c0 = arith.constant 0 : index
    %c0_0 = arith.constant 0 : index
    %0 = vector.load %arg1[%c0, %c0_0] : memref<9x8xf32, #tpu.memory_space<vmem>>, vector<9x8xf32>
    %c0_1 = arith.constant 0 : index
    %c0_2 = arith.constant 0 : index
    %c0_3 = arith.constant 0 : index
    %1 = vector.load %arg0[%c0_1, %c0_2, %c0_3] : memref<4x338x9xf32, #tpu.memory_space<vmem>>, vector<1x338x9xf32>
    %2 = vector.shape_cast %1 : vector<1x338x9xf32> to vector<338x9xf32>
    %cst = arith.constant dense<0.000000e+00> : vector<338x8xf32>
    %3 = tpu.matmul %2, %0, %cst {dimension_numbers = #tpu.dot_dimension_numbers<[1], [0], [0], [1], [0, 0, 1, 1], [], []>} : vector<338x9xf32>, vector<9x8xf32>, vector<338x8xf32> -> vector<338x8xf32>
    %c1 = arith.constant 1 : index
    %c0_4 = arith.constant 0 : index
    %c0_5 = arith.constant 0 : index
    %4 = vector.load %arg0[%c1, %c0_4, %c0_5] : memref<4x338x9xf32, #tpu.memory_space<vmem>>, vector<1x338x9xf32>
    %5 = vector.shape_cast %4 : vector<1x338x9xf32> to vector<338x9xf32>
    %cst_6 = arith.constant dense<0.000000e+00> : vector<338x8xf32>
    %6 = tpu.matmul %5, %0, %cst_6 {dimension_numbers = #tpu.dot_dimension_numbers<[1], [0], [0], [1], [0, 0, 1, 1], [], []>} : vector<338x9xf32>, vector<9x8xf32>, vector<338x8xf32> -> vector<338x8xf32>
    %c2 = arith.constant 2 : index
    %c0_7 = arith.constant 0 : index
    %c0_8 = arith.constant 0 : index
    %7 = vector.load %arg0[%c2, %c0_7, %c0_8] : memref<4x338x9xf32, #tpu.memory_space<vmem>>, vector<1x338x9xf32>
    %8 = vector.shape_cast %7 : vector<1x338x9xf32> to vector<338x9xf32>
    %cst_9 = arith.constant dense<0.000000e+00> : vector<338x8xf32>
    %9 = tpu.matmul %8, %0, %cst_9 {dimension_numbers = #tpu.dot_dimension_numbers<[1], [0], [0], [1], [0, 0, 1, 1], [], []>} : vector<338x9xf32>, vector<9x8xf32>, vector<338x8xf32> -> vector<338x8xf32>
    %c3 = arith.constant 3 : index
    %c0_10 = arith.constant 0 : index
    %c0_11 = arith.constant 0 : index
    %10 = vector.load %arg0[%c3, %c0_10, %c0_11] : memref<4x338x9xf32, #tpu.memory_space<vmem>>, vector<1x338x9xf32>
    %11 = vector.shape_cast %10 : vector<1x338x9xf32> to vector<338x9xf32>
    %cst_12 = arith.constant dense<0.000000e+00> : vector<338x8xf32>
    %12 = tpu.matmul %11, %0, %cst_12 {dimension_numbers = #tpu.dot_dimension_numbers<[1], [0], [0], [1], [0, 0, 1, 1], [], []>} : vector<338x9xf32>, vector<9x8xf32>, vector<338x8xf32> -> vector<338x8xf32>
    %13 = arith.maximumf %3, %6 : vector<338x8xf32>
    %14 = arith.maximumf %9, %12 : vector<338x8xf32>
    %15 = arith.maximumf %13, %14 : vector<338x8xf32>
    %c0_13 = arith.constant 0 : index
    %c0_14 = arith.constant 0 : index
    %16 = vector.load %arg2[%c0_13, %c0_14] : memref<1x8xf32, #tpu.memory_space<vmem>>, vector<1x8xf32>
    %17 = vector.broadcast %16 : vector<1x8xf32> to vector<338x8xf32>
    %18 = arith.addf %15, %17 : vector<338x8xf32>
    %cst_15 = arith.constant 0.000000e+00 : f32
    %19 = vector.broadcast %cst_15 : f32 to vector<338x8xf32>
    %20 = arith.maximumf %18, %19 : vector<338x8xf32>
    %c0_16 = arith.constant 0 : index
    %c0_17 = arith.constant 0 : index
    %21 = vector.load %arg3[%c0_16, %c0_17] : memref<338x8xf32, #tpu.memory_space<vmem>>, vector<338x8xf32>
    tpu.vector_store %arg3[%c0_16, %c0_17], %20 {strides = array<i32>} : memref<338x8xf32, #tpu.memory_space<vmem>>, vector<338x8xf32>,
    return
  }
}

</mosaic_0001>

<bundles_post_ra>
// kernel: tpu_custom_call.1
= control target key start
LH: loop header
LB: loop body
LE: loop exit
PB: predicated region body
PF: predicated region fallthrough
CT: control target
= control target key end

     0   :  { %vm189_vm0 = vcmask 1040384   ;;  %v3141_v0 = vmov 0.0|0.0   ;;  %vm3142_vm1 = vmmov 1   ;;  %vm3143_vm3 = vmmov 0   ;;  %s4821_s1 = inlined_call_operand.vmem [shape: f32[9,8], index: 1, kind: input, shape index: {}]   ;;  %s4822_s0 = inlined_call_operand.vmem [shape: f32[4,338,9], index: 0, kind: input, shape index: {}]   ;;  %s4823_s2 = inlined_call_operand.vmem [shape: f32[1,8], index: 2, kind: input, shape index: {}]   ;;  %s4824_s3 = inlined_call_operand.vmem [shape: f32[338,8], index: 3, kind: output, shape index: {}]  }
   0x1   :  { %3121 = vmatprep.subr.bf16.mxu0 %v3141_v0  ;;  %3125 = vmatprep.subr.bf16.mxu1 %v3141_v0  ;;  %v14_v1 = vld [vmem:[%s4821_s1] sm:$0xff]  ;;  %v15_v2 = vld [vmem:[%s4821_s1 + $0x8] sm:$0x1]  ;;  %vm3171_vm2 = vmpackc.low %vm189_vm0, %vm3142_vm1  ;;  %v3144_v5 = vmov 0.0   ;;  %vm59_vm4 = vcmask 72704   ;;  %vm2054_vm5 = vcmask 64512  }
   0x2   :  { %v3122_v4 = vpack.c.bf16 %v15_v2, %v14_v1  ;;  %2593 = vmatprep.mubr.msk.f32.mxu0 %vm3143_vm3, %v3144_v5  ;;  %2726 = vmatprep.mubr.msk.f32.mxu1 %vm3143_vm3, %v3144_v5  ;;  %v16_v6 = vld [vmem:[%s4822_s0] sm:$0xff]  ;;  %v2147_v7 = vld [vmem:[%s4822_s0 + $0x158] sm:$0xff]  ;;  %v17_v8 = vld [vmem:[%s4822_s0 + $0x8] sm:$0xff]  ;;  %vm2097_vm6 = vcmask 58368  }
   0x3   :  { %v2148_v9 = vld [vmem:[%s4822_s0 + $0x160] sm:$0xff]  ;;  %v18_v10 = vld [vmem:[%s4822_s0 + $0x10] sm:$0xff]  ;;  %v2149_v11 = vld [vmem:[%s4822_s0 + $0x168] sm:$0xff] }
   0x4   :  { %3124 = vmatpush3.bf16.msk.msra.mxu0 %vm3171_vm2, %v3122_v4  ;;  %3128 = vmatpush3.bf16.msk.msra.mxu1 %vm3171_vm2, %v3122_v4  ;;  %v19_v12 = vld [vmem:[%s4822_s0 + $0x18] sm:$0xff]  ;;  %v2150_v13 = vld [vmem:[%s4822_s0 + $0x170] sm:$0xff]  ;;  %v20_v14 = vld [vmem:[%s4822_s0 + $0x20] sm:$0xff] }
   0x5   :  { %3129 = vmatprep.subr.bf16.mxu0 %v3141_v0  ;;  %3133 = vmatprep.subr.bf16.mxu1 %v3141_v0  ;;  %v2151_v15 = vld [vmem:[%s4822_s0 + $0x178] sm:$0xff]  ;;  %v21_v16 = vld [vmem:[%s4822_s0 + $0x28] sm:$0xff]  ;;  %v2152_v17 = vld [vmem:[%s4822_s0 + $0x180] sm:$0xff] }
   0x6   :  { %v22_v18 = vld [vmem:[%s4822_s0 + $0x30] sm:$0xff]  ;;  %v2153_v19 = vld [vmem:[%s4822_s0 + $0x188] sm:$0xff]  ;;  %v23_v20 = vld [vmem:[%s4822_s0 + $0x38] sm:$0xff] }
   0x7   :  { %2594 = vmatmul.mubr.msk.f32.vlgmr.msra.gmra.mrb[0].mxu0 %vm59_vm4, %v16_v6  ;;  %2727 = vmatmul.mubr.msk.f32.vlgmr.msra.gmra.mrb[0].mxu1 %vm59_vm4, %v2147_v7  ;;  %v2154_v21 = vld [vmem:[%s4822_s0 + $0x190] sm:$0xff]  ;;  %v24_v22 = vld [vmem:[%s4822_s0 + $0x40] sm:$0xff]  ;;  %v2155_v23 = vld [vmem:[%s4822_s0 + $0x198] sm:$0xff] }
   0x8   :  { %3132 = vmatpush3.bf16.msk.msra.mxu0 %vm3171_vm2, %v3122_v4  ;;  %3136 = vmatpush3.bf16.msk.msra.mxu1 %vm3171_vm2, %v3122_v4  ;;  %v25_v24 = vld [vmem:[%s4822_s0 + $0x48] sm:$0xff]  ;;  %v2156_v25 = vld [vmem:[%s4822_s0 + $0x1a0] sm:$0xff]  ;;  %v26_v26 = vld [vmem:[%s4822_s0 + $0x50] sm:$0xff] }
   0x9   :  { %2596 = vmatprep.mubr.msk.f32.mxu0 %vm3143_vm3, %v3144_v5  ;;  %2729 = vmatprep.mubr.msk.f32.mxu1 %vm3143_vm3, %v3144_v5  ;;  %v2157_v27 = vld [vmem:[%s4822_s0 + $0x1a8] sm:$0xff]  ;;  %v27_v28 = vld [vmem:[%s4822_s0 + $0x58] sm:$0xff]  ;;  %v2158_v29 = vld [vmem:[%s4822_s0 + $0x1b0] sm:$0xff] }
   0xa   :  { %v28_v30 = vld [vmem:[%s4822_s0 + $0x60] sm:$0xff]  ;;  %v2159_v31 = vld [vmem:[%s4822_s0 + $0x1b8] sm:$0xff]  ;;  %v29_v32 = vld [vmem:[%s4822_s0 + $0x68] sm:$0xff] }
   0xb   :  { %2597 = vmatmul.mubr.msk.f32.gmra.mrb[2].mxu0 %vm59_vm4, %v17_v8  ;;  %2730 = vmatmul.mubr.msk.f32.gmra.mrb[2].mxu1 %vm59_vm4, %v2148_v9  ;;  %v2160_v33 = vld [vmem:[%s4822_s0 + $0x1c0] sm:$0xff]  ;;  %v30_v34 = vld [vmem:[%s4822_s0 + $0x70] sm:$0xff]  ;;  %v2161_v35 = vld [vmem:[%s4822_s0 + $0x1c8] sm:$0xff] }
   0xc   :  { %2599 = vmatprep.mubr.msk.f32.mxu0 %vm3143_vm3, %v3144_v5  ;;  %2732 = vmatprep.mubr.msk.f32.mxu1 %vm3143_vm3, %v3144_v5  ;;  %v31_v36 = vld [vmem:[%s4822_s0 + $0x78] sm:$0xff]  ;;  %v2162_v37 = vld [vmem:[%s4822_s0 + $0x1d0] sm:$0xff]  ;;  %v32_v38 = vld [vmem:[%s4822_s0 + $0x80] sm:$0xff] }
   0xd   :  { %v2163_v39 = vld [vmem:[%s4822_s0 + $0x1d8] sm:$0xff]  ;;  %v33_v40 = vld [vmem:[%s4822_s0 + $0x88] sm:$0xff]  ;;  %v2164_v41 = vld [vmem:[%s4822_s0 + $0x1e0] sm:$0xff] }
   0xe   :  { %v34_v42 = vld [vmem:[%s4822_s0 + $0x90] sm:$0xff]  ;;  %v2165_v43 = vld [vmem:[%s4822_s0 + $0x1e8] sm:$0xff]  ;;  %v35_v44 = vld [vmem:[%s4822_s0 + $0x98] sm:$0xff] }
   0xf   :  { %2600 = vmatmul.mubr.msk.f32.gmra.mrb[4].mxu0 %vm59_vm4, %v18_v10  ;;  %2733 = vmatmul.mubr.msk.f32.gmra.mrb[4].mxu1 %vm59_vm4, %v2149_v11  ;;  %v2166_v45 = vld [vmem:[%s4822_s0 + $0x1f0] sm:$0xff]  ;;  %v36_v46 = vld [vmem:[%s4822_s0 + $0xa0] sm:$0xff]  ;;  %v2167_v47 = vld [vmem:[%s4822_s0 + $0x1f8] sm:$0xff] }
  0x10   :  { %2602 = vmatprep.mubr.msk.f32.mxu0 %vm3143_vm3, %v3144_v5  ;;  %2735 = vmatprep.mubr.msk.f32.mxu1 %vm3143_vm3, %v3144_v5  ;;  %v37_v48 = vld [vmem:[%s4822_s0 + $0xa8] sm:$0xff]  ;;  %v2168_v49 = vld [vmem:[%s4822_s0 + $0x200] sm:$0xff]  ;;  %v38_v50 = vld [vmem:[%s4822_s0 + $0xb0] sm:$0xff] }
  0x11   :  { %v2169_v51 = vld [vmem:[%s4822_s0 + $0x208] sm:$0xff]  ;;  %v39_v52 = vld [vmem:[%s4822_s0 + $0xb8] sm:$0xff]  ;;  %v2170_v53 = vld [vmem:[%s4822_s0 + $0x210] sm:$0xff] }
  0x12   :  { %v40_v54 = vld [vmem:[%s4822_s0 + $0xc0] sm:$0xff]  ;;  %v2171_v55 = vld [vmem:[%s4822_s0 + $0x218] sm:$0xff]  ;;  %v41_v56 = vld [vmem:[%s4822_s0 + $0xc8] sm:$0xff] }
  0x13   :  { %2603 = vmatmul.mubr.msk.f32.gmra.mrb[6].mxu0 %vm59_vm4, %v19_v12  ;;  %2736 = vmatmul.mubr.msk.f32.gmra.mrb[6].mxu1 %vm59_vm4, %v2150_v13  ;;  %v2172_v57 = vld [vmem:[%s4822_s0 + $0x220] sm:$0xff]  ;;  %v42_v58 = vld [vmem:[%s4822_s0 + $0xd0] sm:$0xff]  ;;  %v2173_v59 = vld [vmem:[%s4822_s0 + $0x228] sm:$0xff] }
  0x14   :  { %2605 = vmatprep.mubr.msk.f32.mxu0 %vm3143_vm3, %v3144_v5  ;;  %2738 = vmatprep.mubr.msk.f32.mxu1 %vm3143_vm3, %v3144_v5  ;;  %v43_v60 = vld [vmem:[%s4822_s0 + $0xd8] sm:$0xff]  ;;  %v2174_v61 = vld [vmem:[%s4822_s0 + $0x230] sm:$0xff]  ;;  %v44_v62 = vld [vmem:[%s4822_s0 + $0xe0] sm:$0xff] }
  0x15   :  { %v2175_v63 = vld [vmem:[%s4822_s0 + $0x238] sm:$0xff]  ;;  %v45_v0 = vld [vmem:[%s4822_s0 + $0xe8] sm:$0xff]  ;;  %v2176_v1 = vld [vmem:[%s4822_s0 + $0x240] sm:$0xff] }
  0x16   :  { %v46_v2 = vld [vmem:[%s4822_s0 + $0xf0] sm:$0xff]  ;;  %v2177_v3 = vld [vmem:[%s4822_s0 + $0x248] sm:$0xff]  ;;  %v47_v4 = vld [vmem:[%s4822_s0 + $0xf8] sm:$0xff] }
  0x17   :  { %2606 = vmatmul.mubr.msk.f32.gmra.mrb[8].mxu0 %vm59_vm4, %v20_v14  ;;  %2739 = vmatmul.mubr.msk.f32.gmra.mrb[8].mxu1 %vm59_vm4, %v2151_v15  ;;  %v2178_v6 = vld [vmem:[%s4822_s0 + $0x250] sm:$0xff]  ;;  %v48_v7 = vld [vmem:[%s4822_s0 + $0x100] sm:$0xff]  ;;  %v2179_v8 = vld [vmem:[%s4822_s0 + $0x258] sm:$0xff] }
  0x18   :  { %2608 = vmatprep.mubr.msk.f32.mxu0 %vm3143_vm3, %v3144_v5  ;;  %2741 = vmatprep.mubr.msk.f32.mxu1 %vm3143_vm3, %v3144_v5  ;;  %v49_v9 = vld [vmem:[%s4822_s0 + $0x108] sm:$0xff]  ;;  %v2180_v10 = vld [vmem:[%s4822_s0 + $0x260] sm:$0xff]  ;;  %v50_v11 = vld [vmem:[%s4822_s0 + $0x110] sm:$0xff] }
  0x19   :  { %v2181_v12 = vld [vmem:[%s4822_s0 + $0x268] sm:$0xff]  ;;  %v51_v13 = vld [vmem:[%s4822_s0 + $0x118] sm:$0xff]  ;;  %v2182_v14 = vld [vmem:[%s4822_s0 + $0x270] sm:$0xff] }
  0x1a   :  { %v52_v15 = vld [vmem:[%s4822_s0 + $0x120] sm:$0xff] }
  0x1b   :  { %2609 = vmatmul.mubr.msk.f32.gmra.mrb[10].mxu0 %vm59_vm4, %v21_v16  ;;  %2742 = vmatmul.mubr.msk.f32.gmra.mrb[10].mxu1 %vm59_vm4, %v2152_v17  ;;  %v2183_v16 = vld [vmem:[%s4822_s0 + $0x278] sm:$0xff]  ;;  %v53_v17 = vld [vmem:[%s4822_s0 + $0x128] sm:$0xff] }
  0x1c   :  { %2611 = vmatprep.mubr.msk.f32.mxu0 %vm3143_vm3, %v3144_v5  ;;  %2744 = vmatprep.mubr.msk.f32.mxu1 %vm3143_vm3, %v3144_v5 }
  0x1f   :  { %2612 = vmatmul.mubr.msk.f32.gmra.mrb[12].mxu0 %vm59_vm4, %v22_v18  ;;  %2745 = vmatmul.mubr.msk.f32.gmra.mrb[12].mxu1 %vm59_vm4, %v2153_v19  ;;  %v2184_v18 = vld [vmem:[%s4822_s0 + $0x280] sm:$0xff]  ;;  %v54_v19 = vld [vmem:[%s4822_s0 + $0x130] sm:$0xff] }
  0x20   :  { %2614 = vmatprep.mubr.msk.f32.mxu0 %vm3143_vm3, %v3144_v5  ;;  %2747 = vmatprep.mubr.msk.f32.mxu1 %vm3143_vm3, %v3144_v5 }
  0x23   :  { %2615 = vmatmul.mubr.msk.f32.gmra.mrb[14].mxu0 %vm59_vm4, %v23_v20  ;;  %2748 = vmatmul.mubr.msk.f32.gmra.mrb[14].mxu1 %vm59_vm4, %v2154_v21  ;;  %v2185_v20 = vld [vmem:[%s4822_s0 + $0x288] sm:$0xff]  ;;  %v55_v21 = vld [vmem:[%s4822_s0 + $0x138] sm:$0xff] }
  0x24   :  { %2617 = vmatprep.mubr.msk.f32.mxu0 %vm3143_vm3, %v3144_v5  ;;  %2750 = vmatprep.mubr.msk.f32.mxu1 %vm3143_vm3, %v3144_v5 }
  0x27   :  { %2618 = vmatmul.mubr.msk.f32.gmra.mrb[16].mxu0 %vm59_vm4, %v24_v22  ;;  %2751 = vmatmul.mubr.msk.f32.gmra.mrb[16].mxu1 %vm59_vm4, %v2155_v23  ;;  %v2186_v22 = vld [vmem:[%s4822_s0 + $0x290] sm:$0xff]  ;;  %v56_v23 = vld [vmem:[%s4822_s0 + $0x140] sm:$0xff] }
  0x28   :  { %2620 = vmatprep.mubr.msk.f32.mxu0 %vm3143_vm3, %v3144_v5  ;;  %2753 = vmatprep.mubr.msk.f32.mxu1 %vm3143_vm3, %v3144_v5 }
  0x2b   :  { %2621 = vmatmul.mubr.msk.f32.gmra.mrb[18].mxu0 %vm59_vm4, %v25_v24  ;;  %2754 = vmatmul.mubr.msk.f32.gmra.mrb[18].mxu1 %vm59_vm4, %v2156_v25  ;;  %v2187_v24 = vld [vmem:[%s4822_s0 + $0x298] sm:$0xff]  ;;  %v57_v25 = vld [vmem:[%s4822_s0 + $0x148] sm:$0xff] }
  0x2c   :  { %2623 = vmatprep.mubr.msk.f32.mxu0 %vm3143_vm3, %v3144_v5  ;;  %2756 = vmatprep.mubr.msk.f32.mxu1 %vm3143_vm3, %v3144_v5 }
  0x2f   :  { %2624 = vmatmul.mubr.msk.f32.gmra.mrb[20].mxu0 %vm59_vm4, %v26_v26  ;;  %2757 = vmatmul.mubr.msk.f32.gmra.mrb[20].mxu1 %vm59_vm4, %v2157_v27  ;;  %v2188_v26 = vld [vmem:[%s4822_s0 + $0x2a0] sm:$0xff]  ;;  %v58_v27 = vld [vmem:[%s4822_s0 + $0x150] sm:$0x3] }
  0x30   :  { %2626 = vmatprep.mubr.msk.f32.mxu0 %vm3143_vm3, %v3144_v5  ;;  %2759 = vmatprep.mubr.msk.f32.mxu1 %vm3143_vm3, %v3144_v5 }
  0x33   :  { %2627 = vmatmul.mubr.msk.f32.gmra.mrb[22].mxu0 %vm59_vm4, %v27_v28  ;;  %2760 = vmatmul.mubr.msk.f32.gmra.mrb[22].mxu1 %vm59_vm4, %v2158_v29  ;;  %v2189_v28 = vld [vmem:[%s4822_s0 + $0x2a8] sm:$0x3]  ;;  %v2234_v29 = vld [vmem:[%s4822_s0 + $0x2b0] sm:$0xff] }
  0x34   :  { %2629 = vmatprep.mubr.msk.f32.mxu0 %vm3143_vm3, %v3144_v5  ;;  %2762 = vmatprep.mubr.msk.f32.mxu1 %vm3143_vm3, %v3144_v5 }
  0x37   :  { %2630 = vmatmul.mubr.msk.f32.gmra.mrb[24].mxu0 %vm59_vm4, %v28_v30  ;;  %2763 = vmatmul.mubr.msk.f32.gmra.mrb[24].mxu1 %vm59_vm4, %v2159_v31  ;;  %v2321_v30 = vld [vmem:[%s4822_s0 + $0x408] sm:$0xff]  ;;  %v2235_v31 = vld [vmem:[%s4822_s0 + $0x2b8] sm:$0xff] }
  0x38   :  { %2632 = vmatprep.mubr.msk.f32.mxu0 %vm3143_vm3, %v3144_v5  ;;  %2765 = vmatprep.mubr.msk.f32.mxu1 %vm3143_vm3, %v3144_v5 }
  0x3b   :  { %2633 = vmatmul.mubr.msk.f32.gmra.mrb[26].mxu0 %vm59_vm4, %v29_v32  ;;  %2766 = vmatmul.mubr.msk.f32.gmra.mrb[26].mxu1 %vm59_vm4, %v2160_v33  ;;  %v2322_v32 = vld [vmem:[%s4822_s0 + $0x410] sm:$0xff]  ;;  %v2236_v33 = vld [vmem:[%s4822_s0 + $0x2c0] sm:$0xff] }
  0x3c   :  { %2635 = vmatprep.mubr.msk.f32.mxu0 %vm3143_vm3, %v3144_v5  ;;  %2768 = vmatprep.mubr.msk.f32.mxu1 %vm3143_vm3, %v3144_v5 }
  0x3f   :  { %2636 = vmatmul.mubr.msk.f32.gmra.mrb[28].mxu0 %vm59_vm4, %v30_v34  ;;  %2769 = vmatmul.mubr.msk.f32.gmra.mrb[28].mxu1 %vm59_vm4, %v2161_v35  ;;  %v2323_v34 = vld [vmem:[%s4822_s0 + $0x418] sm:$0xff]  ;;  %v2237_v35 = vld [vmem:[%s4822_s0 + $0x2c8] sm:$0xff] }
  0x40   :  { %2638 = vmatprep.mubr.msk.f32.mxu0 %vm3143_vm3, %v3144_v5  ;;  %2771 = vmatprep.mubr.msk.f32.mxu1 %vm3143_vm3, %v3144_v5 }
  0x43   :  { %2639 = vmatmul.mubr.msk.f32.gmra.mrb[30].mxu0 %vm59_vm4, %v31_v36  ;;  %2772 = vmatmul.mubr.msk.f32.gmra.mrb[30].mxu1 %vm59_vm4, %v2162_v37  ;;  %v2324_v36 = vld [vmem:[%s4822_s0 + $0x420] sm:$0xff]  ;;  %v2238_v37 = vld [vmem:[%s4822_s0 + $0x2d0] sm:$0xff] }
  0x44   :  { %2641 = vmatprep.mubr.msk.f32.mxu0 %vm3143_vm3, %v3144_v5  ;;  %2774 = vmatprep.mubr.msk.f32.mxu1 %vm3143_vm3, %v3144_v5 }
  0x47   :  { %2642 = vmatmul.mubr.msk.f32.gmra.mrb[32].mxu0 %vm59_vm4, %v32_v38  ;;  %2775 = vmatmul.mubr.msk.f32.gmra.mrb[32].mxu1 %vm59_vm4, %v2163_v39  ;;  %v2325_v38 = vld [vmem:[%s4822_s0 + $0x428] sm:$0xff]  ;;  %v2239_v39 = vld [vmem:[%s4822_s0 + $0x2d8] sm:$0xff] }
  0x48   :  { %2644 = vmatprep.mubr.msk.f32.mxu0 %vm3143_vm3, %v3144_v5  ;;  %2777 = vmatprep.mubr.msk.f32.mxu1 %vm3143_vm3, %v3144_v5 }
  0x4b   :  { %2645 = vmatmul.mubr.msk.f32.gmra.mrb[34].mxu0 %vm59_vm4, %v33_v40  ;;  %2778 = vmatmul.mubr.msk.f32.gmra.mrb[34].mxu1 %vm59_vm4, %v2164_v41  ;;  %v2326_v40 = vld [vmem:[%s4822_s0 + $0x430] sm:$0xff]  ;;  %v2240_v41 = vld [vmem:[%s4822_s0 + $0x2e0] sm:$0xff] }
  0x4c   :  { %2647 = vmatprep.mubr.msk.f32.mxu0 %vm3143_vm3, %v3144_v5  ;;  %2780 = vmatprep.mubr.msk.f32.mxu1 %vm3143_vm3, %v3144_v5 }
  0x4f   :  { %2648 = vmatmul.mubr.msk.f32.gmra.mrb[36].mxu0 %vm59_vm4, %v34_v42  ;;  %2781 = vmatmul.mubr.msk.f32.gmra.mrb[36].mxu1 %vm59_vm4, %v2165_v43  ;;  %v2327_v42 = vld [vmem:[%s4822_s0 + $0x438] sm:$0xff]  ;;  %v2241_v43 = vld [vmem:[%s4822_s0 + $0x2e8] sm:$0xff] }
  0x50   :  { %2650 = vmatprep.mubr.msk.f32.mxu0 %vm3143_vm3, %v3144_v5  ;;  %2783 = vmatprep.mubr.msk.f32.mxu1 %vm3143_vm3, %v3144_v5 }
  0x53   :  { %2651 = vmatmul.mubr.msk.f32.gmra.mrb[38].mxu0 %vm59_vm4, %v35_v44  ;;  %2784 = vmatmul.mubr.msk.f32.gmra.mrb[38].mxu1 %vm59_vm4, %v2166_v45  ;;  %v2328_v44 = vld [vmem:[%s4822_s0 + $0x440] sm:$0xff]  ;;  %v2242_v45 = vld [vmem:[%s4822_s0 + $0x2f0] sm:$0xff] }
  0x54   :  { %2653 = vmatprep.mubr.msk.f32.mxu0 %vm3143_vm3, %v3144_v5  ;;  %2786 = vmatprep.mubr.msk.f32.mxu1 %vm3143_vm3, %v3144_v5 }
  0x57   :  { %2654 = vmatmul.mubr.msk.f32.gmra.mrb[40].mxu0 %vm59_vm4, %v36_v46  ;;  %2787 = vmatmul.mubr.msk.f32.gmra.mrb[40].mxu1 %vm59_vm4, %v2167_v47  ;;  %v2329_v46 = vld [vmem:[%s4822_s0 + $0x448] sm:$0xff]  ;;  %v2243_v47 = vld [vmem:[%s4822_s0 + $0x2f8] sm:$0xff] }
  0x58   :  { %2656 = vmatprep.mubr.msk.f32.mxu0 %vm3143_vm3, %v3144_v5  ;;  %2789 = vmatprep.mubr.msk.f32.mxu1 %vm3143_vm3, %v3144_v5 }
  0x5b   :  { %2657 = vmatmul.mubr.msk.f32.gmra.mrb[42].mxu0 %vm59_vm4, %v37_v48  ;;  %2790 = vmatmul.mubr.msk.f32.gmra.mrb[42].mxu1 %vm59_vm4, %v2168_v49  ;;  %v2330_v48 = vld [vmem:[%s4822_s0 + $0x450] sm:$0xff]  ;;  %v2244_v49 = vld [vmem:[%s4822_s0 + $0x300] sm:$0xff] }
  0x5c   :  { %2659 = vmatprep.mubr.msk.f32.mxu0 %vm3143_vm3, %v3144_v5  ;;  %2792 = vmatprep.mubr.msk.f32.mxu1 %vm3143_vm3, %v3144_v5 }
  0x5f   :  { %2660 = vmatmul.mubr.msk.f32.gmra.mrb[44].mxu0 %vm59_vm4, %v38_v50  ;;  %2793 = vmatmul.mubr.msk.f32.gmra.mrb[44].mxu1 %vm59_vm4, %v2169_v51  ;;  %v2331_v50 = vld [vmem:[%s4822_s0 + $0x458] sm:$0xff] }
  0x60   :  { %2662 = vmatprep.mubr.msk.f32.mxu0 %vm3143_vm3, %v3144_v5  ;;  %2795 = vmatprep.mubr.msk.f32.mxu1 %vm3143_vm3, %v3144_v5 }
  0x63   :  { %2663 = vmatmul.mubr.msk.f32.gmra.mrb[46].mxu0 %vm59_vm4, %v39_v52  ;;  %2796 = vmatmul.mubr.msk.f32.gmra.mrb[46].mxu1 %vm59_vm4, %v2170_v53 }
  0x64   :  { %2665 = vmatprep.mubr.msk.f32.mxu0 %vm3143_vm3, %v3144_v5  ;;  %2798 = vmatprep.mubr.msk.f32.mxu1 %vm3143_vm3, %v3144_v5 }
  0x67   :  { %2666 = vmatmul.mubr.msk.f32.gmra.mrb[48].mxu0 %vm59_vm4, %v40_v54  ;;  %2799 = vmatmul.mubr.msk.f32.gmra.mrb[48].mxu1 %vm59_vm4, %v2171_v55 }
  0x68   :  { %2668 = vmatprep.mubr.msk.f32.mxu0 %vm3143_vm3, %v3144_v5  ;;  %2801 = vmatprep.mubr.msk.f32.mxu1 %vm3143_vm3, %v3144_v5 }
  0x6b   :  { %2669 = vmatmul.mubr.msk.f32.gmra.mrb[50].mxu0 %vm59_vm4, %v41_v56  ;;  %2802 = vmatmul.mubr.msk.f32.gmra.mrb[50].mxu1 %vm59_vm4, %v2172_v57  ;;  %v2245_v56 = vld [vmem:[%s4822_s0 + $0x308] sm:$0xff]  ;;  %v2332_v57 = vld [vmem:[%s4822_s0 + $0x460] sm:$0xff] }
  0x6c   :  { %2671 = vmatprep.mubr.msk.f32.mxu0 %vm3143_vm3, %v3144_v5  ;;  %2804 = vmatprep.mubr.msk.f32.mxu1 %vm3143_vm3, %v3144_v5 }
  0x6f   :  { %2672 = vmatmul.mubr.msk.f32.gmra.mrb[52].mxu0 %vm59_vm4, %v42_v58  ;;  %2805 = vmatmul.mubr.msk.f32.gmra.mrb[52].mxu1 %vm59_vm4, %v2173_v59 }
  0x70   :  { %2674 = vmatprep.mubr.msk.f32.mxu0 %vm3143_vm3, %v3144_v5  ;;  %2807 = vmatprep.mubr.msk.f32.mxu1 %vm3143_vm3, %v3144_v5 }
  0x73   :  { %2675 = vmatmul.mubr.msk.f32.gmra.mrb[54].mxu0 %vm59_vm4, %v43_v60  ;;  %2808 = vmatmul.mubr.msk.f32.gmra.mrb[54].mxu1 %vm59_vm4, %v2174_v61  ;;  %v2272_v60 = vld [vmem:[%s4822_s0 + $0x3e0] sm:$0xff] }
  0x74   :  { %2677 = vmatprep.mubr.msk.f32.mxu0 %vm3143_vm3, %v3144_v5  ;;  %2810 = vmatprep.mubr.msk.f32.mxu1 %vm3143_vm3, %v3144_v5 }
  0x77   :  { %2678 = vmatmul.mubr.msk.f32.gmra.mrb[56].mxu0 %vm59_vm4, %v44_v62  ;;  %2811 = vmatmul.mubr.msk.f32.gmra.mrb[56].mxu1 %vm59_vm4, %v2175_v63  ;;  %v2246_v63 = vld [vmem:[%s4822_s0 + $0x310] sm:$0xff] }
  0x78   :  { %2680 = vmatprep.mubr.msk.f32.mxu0 %vm3143_vm3, %v3144_v5  ;;  %2813 = vmatprep.mubr.msk.f32.mxu1 %vm3143_vm3, %v3144_v5 }
  0x7b   :  { %2681 = vmatmul.mubr.msk.f32.gmra.mrb[58].mxu0 %vm59_vm4, %v45_v0  ;;  %2814 = vmatmul.mubr.msk.f32.gmra.mrb[58].mxu1 %vm59_vm4, %v2176_v1  ;;  %v2333_v0 = vld [vmem:[%s4822_s0 + $0x468] sm:$0xff] }
  0x7c   :  { %2683 = vmatprep.mubr.msk.f32.mxu0 %vm3143_vm3, %v3144_v5  ;;  %2816 = vmatprep.mubr.msk.f32.mxu1 %vm3143_vm3, %v3144_v5 }
  0x7f   :  { %2684 = vmatmul.mubr.msk.f32.gmra.mrb[60].mxu0 %vm59_vm4, %v46_v2  ;;  %2817 = vmatmul.mubr.msk.f32.gmra.mrb[60].mxu1 %vm59_vm4, %v2177_v3 }
  0x80   :  { %2686 = vmatprep.mubr.msk.f32.mxu0 %vm3143_vm3, %v3144_v5  ;;  %2819 = vmatprep.mubr.msk.f32.mxu1 %vm3143_vm3, %v3144_v5 }
  0x83   :  { %2687 = vmatmul.mubr.msk.f32.gmra.mrb[62].mxu0 %vm59_vm4, %v47_v4  ;;  %2820 = vmatmul.mubr.msk.f32.gmra.mrb[62].mxu1 %vm59_vm4, %v2178_v6 }
  0x84   :  { %2689 = vmatprep.mubr.msk.f32.mxu0 %vm3143_vm3, %v3144_v5  ;;  %2822 = vmatprep.mubr.msk.f32.mxu1 %vm3143_vm3, %v3144_v5 }
  0x87   :  { %2690 = vmatmul.mubr.msk.f32.gmra.mrb[64].mxu0 %vm59_vm4, %v48_v7  ;;  %2823 = vmatmul.mubr.msk.f32.gmra.mrb[64].mxu1 %vm59_vm4, %v2179_v8  ;;  %v2247_v7 = vld [vmem:[%s4822_s0 + $0x318] sm:$0xff]  ;;  %v2334_v8 = vld [vmem:[%s4822_s0 + $0x470] sm:$0xff] }
  0x88   :  { %2692 = vmatprep.mubr.msk.f32.mxu0 %vm3143_vm3, %v3144_v5  ;;  %2825 = vmatprep.mubr.msk.f32.mxu1 %vm3143_vm3, %v3144_v5 }
  0x8b   :  { %2693 = vmatmul.mubr.msk.f32.gmra.mrb[66].mxu0 %vm59_vm4, %v49_v9  ;;  %2826 = vmatmul.mubr.msk.f32.gmra.mrb[66].mxu1 %vm59_vm4, %v2180_v10 }
  0x8c   :  { %2695 = vmatprep.mubr.msk.f32.mxu0 %vm3143_vm3, %v3144_v5  ;;  %2828 = vmatprep.mubr.msk.f32.mxu1 %vm3143_vm3, %v3144_v5 }
  0x8f   :  { %2696 = vmatmul.mubr.msk.f32.gmra.mrb[68].mxu0 %vm59_vm4, %v50_v11  ;;  %2829 = vmatmul.mubr.msk.f32.gmra.mrb[68].mxu1 %vm59_vm4, %v2181_v12  ;;  %v2271_v11 = vld [vmem:[%s4822_s0 + $0x3d8] sm:$0xff] }
  0x90   :  { %2698 = vmatprep.mubr.msk.f32.mxu0 %vm3143_vm3, %v3144_v5  ;;  %2831 = vmatprep.mubr.msk.f32.mxu1 %vm3143_vm3, %v3144_v5 }
  0x93   :  { %2699 = vmatmul.mubr.msk.f32.gmra.mrb[70].mxu0 %vm59_vm4, %v51_v13  ;;  %2832 = vmatmul.mubr.msk.f32.gmra.mrb[70].mxu1 %vm59_vm4, %v2182_v14  ;;  %v2248_v14 = vld [vmem:[%s4822_s0 + $0x320] sm:$0xff] }
  0x94   :  { %2701 = vmatprep.mubr.msk.f32.mxu0 %vm3143_vm3, %v3144_v5  ;;  %2834 = vmatprep.mubr.msk.f32.mxu1 %vm3143_vm3, %v3144_v5 }
  0x97   :  { %2702 = vmatmul.mubr.msk.f32.gmra.mrb[72].mxu0 %vm59_vm4, %v52_v15  ;;  %2835 = vmatmul.mubr.msk.f32.gmra.mrb[72].mxu1 %vm59_vm4, %v2183_v16  ;;  %v2335_v15 = vld [vmem:[%s4822_s0 + $0x478] sm:$0xff] }
  0x98   :  { %2704 = vmatprep.mubr.msk.f32.mxu0 %vm3143_vm3, %v3144_v5  ;;  %2837 = vmatprep.mubr.msk.f32.mxu1 %vm3143_vm3, %v3144_v5 }
  0x9b   :  { %2705 = vmatmul.mubr.msk.f32.gmra.mrb[74].mxu0 %vm59_vm4, %v53_v17  ;;  %2838 = vmatmul.mubr.msk.f32.gmra.mrb[74].mxu1 %vm59_vm4, %v2184_v18 }
  0x9c   :  { %2707 = vmatprep.mubr.msk.f32.mxu0 %vm3143_vm3, %v3144_v5  ;;  %2840 = vmatprep.mubr.msk.f32.mxu1 %vm3143_vm3, %v3144_v5 }
  0x9f   :  { %2708 = vmatmul.mubr.msk.f32.gmra.mrb[76].mxu0 %vm59_vm4, %v54_v19  ;;  %2841 = vmatmul.mubr.msk.f32.gmra.mrb[76].mxu1 %vm59_vm4, %v2185_v20 }
  0xa0   :  { %2710 = vmatprep.mubr.msk.f32.mxu0 %vm3143_vm3, %v3144_v5  ;;  %2843 = vmatprep.mubr.msk.f32.mxu1 %vm3143_vm3, %v3144_v5 }
  0xa3   :  { %2711 = vmatmul.mubr.msk.f32.gmra.mrb[78].mxu0 %vm59_vm4, %v55_v21  ;;  %2844 = vmatmul.mubr.msk.f32.gmra.mrb[78].mxu1 %vm59_vm4, %v2186_v22  ;;  %v2249_v21 = vld [vmem:[%s4822_s0 + $0x328] sm:$0xff]  ;;  %v2336_v22 = vld [vmem:[%s4822_s0 + $0x480] sm:$0xff] }
  0xa4   :  { %2713 = vmatprep.mubr.msk.f32.mxu0 %vm3143_vm3, %v3144_v5  ;;  %2846 = vmatprep.mubr.msk.f32.mxu1 %vm3143_vm3, %v3144_v5 }
  0xa7   :  { %2714 = vmatmul.mubr.msk.f32.gmra.mrb[80].mxu0 %vm59_vm4, %v56_v23  ;;  %2847 = vmatmul.mubr.msk.f32.gmra.mrb[80].mxu1 %vm59_vm4, %v2187_v24 }
  0xa8   :  { %2716 = vmatprep.mubr.msk.f32.mxu0 %vm3143_vm3, %v3144_v5  ;;  %2849 = vmatprep.mubr.msk.f32.mxu1 %vm3143_vm3, %v3144_v5 }
  0xab   :  { %2717 = vmatmul.mubr.msk.f32.gmra.mrb[82].mxu0 %vm59_vm4, %v57_v25  ;;  %2850 = vmatmul.mubr.msk.f32.gmra.mrb[82].mxu1 %vm59_vm4, %v2188_v26  ;;  %v2270_v25 = vld [vmem:[%s4822_s0 + $0x3d0] sm:$0xff] }
  0xac   :  { %2719 = vmatprep.mubr.msk.f32.mxu0 %vm3143_vm3, %v3144_v5  ;;  %2852 = vmatprep.mubr.msk.f32.mxu1 %vm3143_vm3, %v3144_v5 }
  0xaf   :  { %2720 = vmatmul.mubr.msk.f32.gmra.mrb[84].mxu0 %vm59_vm4, %v58_v27  ;;  %2853 = vmatmul.mubr.msk.f32.gmra.mrb[84].mxu1 %vm59_vm4, %v2189_v28  ;;  %v2250_v28 = vld [vmem:[%s4822_s0 + $0x330] sm:$0xff] }
  0xb0   :  { %2859 = vmatprep.mubr.msk.f32.mxu0 %vm3143_vm3, %v3144_v5  ;;  %2992 = vmatprep.mubr.msk.f32.mxu1 %vm3143_vm3, %v3144_v5 }
  0xb3   :  { %2860 = vmatmul.mubr.msk.f32.vlgmr.msra.gmra.mrb[86].mxu0 %vm59_vm4, %v2234_v29  ;;  %2993 = vmatmul.mubr.msk.f32.vlgmr.msra.gmra.mrb[86].mxu1 %vm59_vm4, %v2321_v30  ;;  %v2337_v29 = vld [vmem:[%s4822_s0 + $0x488] sm:$0xff] }
  0xb4   :  { %2862 = vmatprep.mubr.msk.f32.mxu0 %vm3143_vm3, %v3144_v5  ;;  %2995 = vmatprep.mubr.msk.f32.mxu1 %vm3143_vm3, %v3144_v5 }
  0xb7   :  { %2863 = vmatmul.mubr.msk.f32.gmra.mrb[88].mxu0 %vm59_vm4, %v2235_v31  ;;  %2996 = vmatmul.mubr.msk.f32.gmra.mrb[88].mxu1 %vm59_vm4, %v2322_v32 }
  0xb8   :  { %2865 = vmatprep.mubr.msk.f32.mxu0 %vm3143_vm3, %v3144_v5  ;;  %2998 = vmatprep.mubr.msk.f32.mxu1 %vm3143_vm3, %v3144_v5 }
  0xbb   :  { %2866 = vmatmul.mubr.msk.f32.gmra.mrb[90].mxu0 %vm59_vm4, %v2236_v33  ;;  %2999 = vmatmul.mubr.msk.f32.gmra.mrb[90].mxu1 %vm59_vm4, %v2323_v34 }
  0xbc   :  { %2868 = vmatprep.mubr.msk.f32.mxu0 %vm3143_vm3, %v3144_v5  ;;  %3001 = vmatprep.mubr.msk.f32.mxu1 %vm3143_vm3, %v3144_v5 }
  0xbf   :  { %2869 = vmatmul.mubr.msk.f32.gmra.mrb[92].mxu0 %vm59_vm4, %v2237_v35  ;;  %3002 = vmatmul.mubr.msk.f32.gmra.mrb[92].mxu1 %vm59_vm4, %v2324_v36  ;;  %v2251_v35 = vld [vmem:[%s4822_s0 + $0x338] sm:$0xff]  ;;  %v2338_v36 = vld [vmem:[%s4822_s0 + $0x490] sm:$0xff] }
  0xc0   :  { %2871 = vmatprep.mubr.msk.f32.mxu0 %vm3143_vm3, %v3144_v5  ;;  %3004 = vmatprep.mubr.msk.f32.mxu1 %vm3143_vm3, %v3144_v5 }
  0xc3   :  { %2872 = vmatmul.mubr.msk.f32.gmra.mrb[94].mxu0 %vm59_vm4, %v2238_v37  ;;  %3005 = vmatmul.mubr.msk.f32.gmra.mrb[94].mxu1 %vm59_vm4, %v2325_v38 }
  0xc4   :  { %2874 = vmatprep.mubr.msk.f32.mxu0 %vm3143_vm3, %v3144_v5  ;;  %3007 = vmatprep.mubr.msk.f32.mxu1 %vm3143_vm3, %v3144_v5 }
  0xc7   :  { %2875 = vmatmul.mubr.msk.f32.gmra.mrb[96].mxu0 %vm59_vm4, %v2239_v39  ;;  %3008 = vmatmul.mubr.msk.f32.gmra.mrb[96].mxu1 %vm59_vm4, %v2326_v40  ;;  %v2269_v39 = vld [vmem:[%s4822_s0 + $0x3c8] sm:$0xff] }
  0xc8   :  { %2877 = vmatprep.mubr.msk.f32.mxu0 %vm3143_vm3, %v3144_v5  ;;  %3010 = vmatprep.mubr.msk.f32.mxu1 %vm3143_vm3, %v3144_v5 }
  0xcb   :  { %2878 = vmatmul.mubr.msk.f32.gmra.mrb[98].mxu0 %vm59_vm4, %v2240_v41  ;;  %3011 = vmatmul.mubr.msk.f32.gmra.mrb[98].mxu1 %vm59_vm4, %v2327_v42  ;;  %v2252_v42 = vld [vmem:[%s4822_s0 + $0x340] sm:$0xff] }
  0xcc   :  { %2880 = vmatprep.mubr.msk.f32.mxu0 %vm3143_vm3, %v3144_v5  ;;  %3013 = vmatprep.mubr.msk.f32.mxu1 %vm3143_vm3, %v3144_v5 }
  0xcf   :  { %2881 = vmatmul.mubr.msk.f32.gmra.mrb[100].mxu0 %vm59_vm4, %v2241_v43  ;;  %3014 = vmatmul.mubr.msk.f32.gmra.mrb[100].mxu1 %vm59_vm4, %v2328_v44  ;;  %v2339_v43 = vld [vmem:[%s4822_s0 + $0x498] sm:$0xff] }
  0xd0   :  { %2883 = vmatprep.mubr.msk.f32.mxu0 %vm3143_vm3, %v3144_v5  ;;  %3016 = vmatprep.mubr.msk.f32.mxu1 %vm3143_vm3, %v3144_v5 }
  0xd3   :  { %2884 = vmatmul.mubr.msk.f32.gmra.mrb[102].mxu0 %vm59_vm4, %v2242_v45  ;;  %3017 = vmatmul.mubr.msk.f32.gmra.mrb[102].mxu1 %vm59_vm4, %v2329_v46 }
  0xd4   :  { %2886 = vmatprep.mubr.msk.f32.mxu0 %vm3143_vm3, %v3144_v5  ;;  %3019 = vmatprep.mubr.msk.f32.mxu1 %vm3143_vm3, %v3144_v5 }
  0xd7   :  { %2887 = vmatmul.mubr.msk.f32.gmra.mrb[104].mxu0 %vm59_vm4, %v2243_v47  ;;  %3020 = vmatmul.mubr.msk.f32.gmra.mrb[104].mxu1 %vm59_vm4, %v2330_v48 }
  0xd8   :  { %2889 = vmatprep.mubr.msk.f32.mxu0 %vm3143_vm3, %v3144_v5  ;;  %3022 = vmatprep.mubr.msk.f32.mxu1 %vm3143_vm3, %v3144_v5 }
  0xda   :  { %v3829_v51 = vpop.f32.mrb[0].mxu0  ;;  %v3831_v52 = vpop.f32.mrb[0].mxu1 }
  0xdb   :  { %v2595_v54 = vpop.f32.mrb[1].mxu0  ;;  %v2728_v55 = vpop.f32.mrb[1].mxu1  ;;  %2890 = vmatmul.mubr.msk.f32.gmra.mrb[106].mxu0 %vm59_vm4, %v2244_v49  ;;  %3023 = vmatmul.mubr.msk.f32.gmra.mrb[106].mxu1 %vm59_vm4, %v2331_v50  ;;  %v2253_v49 = vld [vmem:[%s4822_s0 + $0x348] sm:$0xff]  ;;  %v2340_v50 = vld [vmem:[%s4822_s0 + $0x4a0] sm:$0xff] }
  0xdc   :  { %2892 = vmatprep.mubr.msk.f32.mxu0 %vm3143_vm3, %v3144_v5  ;;  %3025 = vmatprep.mubr.msk.f32.mxu1 %vm3143_vm3, %v3144_v5 }
  0xde   :  { %v3847_v58 = vpop.f32.mrb[2].mxu0  ;;  %v3849_v59 = vpop.f32.mrb[2].mxu1 }
  0xdf   :  { %v2598_v61 = vpop.f32.mrb[3].mxu0  ;;  %v2731_v62 = vpop.f32.mrb[3].mxu1  ;;  %2893 = vmatmul.mubr.msk.f32.gmra.mrb[108].mxu0 %vm59_vm4, %v2245_v56  ;;  %3026 = vmatmul.mubr.msk.f32.gmra.mrb[108].mxu1 %vm59_vm4, %v2332_v57  ;;  %v2268_v56 = vld [vmem:[%s4822_s0 + $0x3c0] sm:$0xff] }
  0xe0   :  { %2895 = vmatprep.mubr.msk.f32.mxu0 %vm3143_vm3, %v3144_v5  ;;  %3028 = vmatprep.mubr.msk.f32.mxu1 %vm3143_vm3, %v3144_v5  ;;  %v2254_v62 = vld [vmem:[%s4822_s0 + $0x350] sm:$0xff] }
  0xe2   :  { %v3865_v1 = vpop.f32.mrb[4].mxu0  ;;  %v3867_v2 = vpop.f32.mrb[4].mxu1 }
  0xe3   :  { %v2601_v4 = vpop.f32.mrb[5].mxu0  ;;  %v2734_v6 = vpop.f32.mrb[5].mxu1  ;;  %2896 = vmatmul.mubr.msk.f32.gmra.mrb[110].mxu0 %vm59_vm4, %v2246_v63  ;;  %3029 = vmatmul.mubr.msk.f32.gmra.mrb[110].mxu1 %vm59_vm4, %v2333_v0  ;;  %v2341_v63 = vld [vmem:[%s4822_s0 + $0x4a8] sm:$0xff] }
  0xe4   :  { %2898 = vmatprep.mubr.msk.f32.mxu0 %vm3143_vm3, %v3144_v5  ;;  %3031 = vmatprep.mubr.msk.f32.mxu1 %vm3143_vm3, %v3144_v5 }
  0xe6   :  { %v3883_v9 = vpop.f32.mrb[6].mxu0  ;;  %v3885_v10 = vpop.f32.mrb[6].mxu1 }
  0xe7   :  { %v2604_v12 = vpop.f32.mrb[7].mxu0  ;;  %v2737_v13 = vpop.f32.mrb[7].mxu1  ;;  %2899 = vmatmul.mubr.msk.f32.gmra.mrb[112].mxu0 %vm59_vm4, %v2247_v7  ;;  %3032 = vmatmul.mubr.msk.f32.gmra.mrb[112].mxu1 %vm59_vm4, %v2334_v8 }
  0xe8   :  { %2901 = vmatprep.mubr.msk.f32.mxu0 %vm3143_vm3, %v3144_v5  ;;  %3034 = vmatprep.mubr.msk.f32.mxu1 %vm3143_vm3, %v3144_v5  ;;  %v2255_v12 = vld [vmem:[%s4822_s0 + $0x358] sm:$0xff]  ;;  %v2342_v13 = vld [vmem:[%s4822_s0 + $0x4b0] sm:$0xff] }
  0xea   :  { %v3901_v16 = vpop.f32.mrb[8].mxu0  ;;  %v3903_v17 = vpop.f32.mrb[8].mxu1 }
  0xeb   :  { %v2607_v19 = vpop.f32.mrb[9].mxu0  ;;  %v2740_v20 = vpop.f32.mrb[9].mxu1  ;;  %2902 = vmatmul.mubr.msk.f32.gmra.mrb[114].mxu0 %vm59_vm4, %v2248_v14  ;;  %3035 = vmatmul.mubr.msk.f32.gmra.mrb[114].mxu1 %vm59_vm4, %v2335_v15 }
  0xec   :  { %2904 = vmatprep.mubr.msk.f32.mxu0 %vm3143_vm3, %v3144_v5  ;;  %3037 = vmatprep.mubr.msk.f32.mxu1 %vm3143_vm3, %v3144_v5  ;;  %v2267_v19 = vld [vmem:[%s4822_s0 + $0x3b8] sm:$0xff] }
  0xee   :  { %v3919_v23 = vpop.f32.mrb[10].mxu0  ;;  %v3921_v24 = vpop.f32.mrb[10].mxu1 }
  0xef   :  { %v2610_v26 = vpop.f32.mrb[11].mxu0  ;;  %v2743_v27 = vpop.f32.mrb[11].mxu1  ;;  %2905 = vmatmul.mubr.msk.f32.gmra.mrb[116].mxu0 %vm59_vm4, %v2249_v21  ;;  %3038 = vmatmul.mubr.msk.f32.gmra.mrb[116].mxu1 %vm59_vm4, %v2336_v22  ;;  %v2256_v22 = vld [vmem:[%s4822_s0 + $0x360] sm:$0xff] }
  0xf0   :  { %2907 = vmatprep.mubr.msk.f32.mxu0 %vm3143_vm3, %v3144_v5  ;;  %3040 = vmatprep.mubr.msk.f32.mxu1 %vm3143_vm3, %v3144_v5  ;;  %v2343_v26 = vld [vmem:[%s4822_s0 + $0x4b8] sm:$0xff] }
  0xf2   :  { %v3937_v30 = vpop.f32.mrb[12].mxu0  ;;  %v3939_v31 = vpop.f32.mrb[12].mxu1 }
  0xf3   :  { %v2613_v33 = vpop.f32.mrb[13].mxu0  ;;  %v2746_v34 = vpop.f32.mrb[13].mxu1  ;;  %2908 = vmatmul.mubr.msk.f32.gmra.mrb[118].mxu0 %vm59_vm4, %v2250_v28  ;;  %3041 = vmatmul.mubr.msk.f32.gmra.mrb[118].mxu1 %vm59_vm4, %v2337_v29 }
  0xf4   :  { %2910 = vmatprep.mubr.msk.f32.mxu0 %vm3143_vm3, %v3144_v5  ;;  %3043 = vmatprep.mubr.msk.f32.mxu1 %vm3143_vm3, %v3144_v5 }
  0xf6   :  { %v3955_v37 = vpop.f32.mrb[14].mxu0  ;;  %v3957_v38 = vpop.f32.mrb[14].mxu1 }
  0xf7   :  { %v2616_v40 = vpop.f32.mrb[15].mxu0  ;;  %v2749_v41 = vpop.f32.mrb[15].mxu1  ;;  %2911 = vmatmul.mubr.msk.f32.gmra.mrb[120].mxu0 %vm59_vm4, %v2251_v35  ;;  %3044 = vmatmul.mubr.msk.f32.gmra.mrb[120].mxu1 %vm59_vm4, %v2338_v36  ;;  %v2257_v35 = vld [vmem:[%s4822_s0 + $0x368] sm:$0xff]  ;;  %v2344_v36 = vld [vmem:[%s4822_s0 + $0x4c0] sm:$0xff] }
  0xf8   :  { %2913 = vmatprep.mubr.msk.f32.mxu0 %vm3143_vm3, %v3144_v5  ;;  %3046 = vmatprep.mubr.msk.f32.mxu1 %vm3143_vm3, %v3144_v5 }
  0xfa   :  { %v3973_v44 = vpop.f32.mrb[16].mxu0  ;;  %v3975_v45 = vpop.f32.mrb[16].mxu1 }
  0xfb   :  { %v2619_v47 = vpop.f32.mrb[17].mxu0  ;;  %v2752_v48 = vpop.f32.mrb[17].mxu1  ;;  %2914 = vmatmul.mubr.msk.f32.gmra.mrb[122].mxu0 %vm59_vm4, %v2252_v42  ;;  %3047 = vmatmul.mubr.msk.f32.gmra.mrb[122].mxu1 %vm59_vm4, %v2339_v43  ;;  %v2266_v42 = vld [vmem:[%s4822_s0 + $0x3b0] sm:$0xff] }
  0xfc   :  { %2916 = vmatprep.mubr.msk.f32.mxu0 %vm3143_vm3, %v3144_v5  ;;  %3049 = vmatprep.mubr.msk.f32.mxu1 %vm3143_vm3, %v3144_v5  ;;  %v2258_v48 = vld [vmem:[%s4822_s0 + $0x370] sm:$0xff] }
  0xfe   :  { %v3991_v54 = vpop.f32.mrb[18].mxu0  ;;  %v3993_v55 = vpop.f32.mrb[18].mxu1 }
  0xff   :  { %v2622_v57 = vpop.f32.mrb[19].mxu0  ;;  %v2755_v61 = vpop.f32.mrb[19].mxu1  ;;  %2917 = vmatmul.mubr.msk.f32.gmra.mrb[124].mxu0 %vm59_vm4, %v2253_v49  ;;  %3050 = vmatmul.mubr.msk.f32.gmra.mrb[124].mxu1 %vm59_vm4, %v2340_v50  ;;  %v2345_v49 = vld [vmem:[%s4822_s0 + $0x4c8] sm:$0xff] }
 0x100   :  { %2919 = vmatprep.mubr.msk.f32.mxu0 %vm3143_vm3, %v3144_v5  ;;  %3052 = vmatprep.mubr.msk.f32.mxu1 %vm3143_vm3, %v3144_v5 }
 0x102   :  { %v4009_v0 = vpop.f32.mrb[20].mxu0  ;;  %v4011_v4 = vpop.f32.mrb[20].mxu1 }
 0x103   :  { %v2625_v7 = vpop.f32.mrb[21].mxu0  ;;  %v2758_v8 = vpop.f32.mrb[21].mxu1  ;;  %2920 = vmatmul.mubr.msk.f32.gmra.mrb[126].mxu0 %vm59_vm4, %v2254_v62  ;;  %3053 = vmatmul.mubr.msk.f32.gmra.mrb[126].mxu1 %vm59_vm4, %v2341_v63 }
 0x104   :  { %2922 = vmatprep.mubr.msk.f32.mxu0 %vm3143_vm3, %v3144_v5  ;;  %3055 = vmatprep.mubr.msk.f32.mxu1 %vm3143_vm3, %v3144_v5  ;;  %v2259_v7 = vld [vmem:[%s4822_s0 + $0x378] sm:$0xff]  ;;  %v2346_v8 = vld [vmem:[%s4822_s0 + $0x4d0] sm:$0xff] }
 0x106   :  { %v4027_v14 = vpop.f32.mrb[22].mxu0  ;;  %v4029_v15 = vpop.f32.mrb[22].mxu1 }
 0x107   :  { %v2628_v20 = vpop.f32.mrb[23].mxu0  ;;  %v2761_v21 = vpop.f32.mrb[23].mxu1  ;;  %2923 = vmatmul.mubr.msk.f32.gmra.mrb[128].mxu0 %vm59_vm4, %v2255_v12  ;;  %3056 = vmatmul.mubr.msk.f32.gmra.mrb[128].mxu1 %vm59_vm4, %v2342_v13 }
 0x108   :  { %2925 = vmatprep.mubr.msk.f32.mxu0 %vm3143_vm3, %v3144_v5  ;;  %3058 = vmatprep.mubr.msk.f32.mxu1 %vm3143_vm3, %v3144_v5  ;;  %v2265_v20 = vld [vmem:[%s4822_s0 + $0x3a8] sm:$0xff] }
 0x10a   :  { %v4045_v27 = vpop.f32.mrb[24].mxu0  ;;  %v4047_v28 = vpop.f32.mrb[24].mxu1 }
 0x10b   :  { %v2631_v33 = vpop.f32.mrb[25].mxu0  ;;  %v2764_v34 = vpop.f32.mrb[25].mxu1  ;;  %2926 = vmatmul.mubr.msk.f32.gmra.mrb[130].mxu0 %vm59_vm4, %v2256_v22  ;;  %3059 = vmatmul.mubr.msk.f32.gmra.mrb[130].mxu1 %vm59_vm4, %v2343_v26  ;;  %v2260_v26 = vld [vmem:[%s4822_s0 + $0x380] sm:$0xff] }
 0x10c   :  { %2928 = vmatprep.mubr.msk.f32.mxu0 %vm3143_vm3, %v3144_v5  ;;  %3061 = vmatprep.mubr.msk.f32.mxu1 %vm3143_vm3, %v3144_v5  ;;  %v2347_v33 = vld [vmem:[%s4822_s0 + $0x4d8] sm:$0xff] }
 0x10e   :  { %v4063_v40 = vpop.f32.mrb[26].mxu0  ;;  %v4065_v41 = vpop.f32.mrb[26].mxu1 }
 0x10f   :  { %v2634_v43 = vpop.f32.mrb[27].mxu0  ;;  %v2767_v47 = vpop.f32.mrb[27].mxu1  ;;  %2929 = vmatmul.mubr.msk.f32.gmra.mrb[132].mxu0 %vm59_vm4, %v2257_v35  ;;  %3062 = vmatmul.mubr.msk.f32.gmra.mrb[132].mxu1 %vm59_vm4, %v2344_v36 }
 0x110   :  { %2931 = vmatprep.mubr.msk.f32.mxu0 %vm3143_vm3, %v3144_v5  ;;  %3064 = vmatprep.mubr.msk.f32.mxu1 %vm3143_vm3, %v3144_v5 }
 0x112   :  { %v4081_v50 = vpop.f32.mrb[28].mxu0  ;;  %v4083_v57 = vpop.f32.mrb[28].mxu1 }
 0x113   :  { %v2637_v62 = vpop.f32.mrb[29].mxu0  ;;  %v2770_v63 = vpop.f32.mrb[29].mxu1  ;;  %2932 = vmatmul.mubr.msk.f32.gmra.mrb[134].mxu0 %vm59_vm4, %v2258_v48  ;;  %3065 = vmatmul.mubr.msk.f32.gmra.mrb[134].mxu1 %vm59_vm4, %v2345_v49  ;;  %v2261_v48 = vld [vmem:[%s4822_s0 + $0x388] sm:$0xff]  ;;  %v2348_v49 = vld [vmem:[%s4822_s0 + $0x4e0] sm:$0xff] }
 0x114   :  { %2934 = vmatprep.mubr.msk.f32.mxu0 %vm3143_vm3, %v3144_v5  ;;  %3067 = vmatprep.mubr.msk.f32.mxu1 %vm3143_vm3, %v3144_v5 }
 0x116   :  { %v4099_v12 = vpop.f32.mrb[30].mxu0  ;;  %v4101_v13 = vpop.f32.mrb[30].mxu1 }
 0x117   :  { %v2640_v21 = vpop.f32.mrb[31].mxu0  ;;  %v2773_v22 = vpop.f32.mrb[31].mxu1  ;;  %2935 = vmatmul.mubr.msk.f32.gmra.mrb[136].mxu0 %vm59_vm4, %v2259_v7  ;;  %3068 = vmatmul.mubr.msk.f32.gmra.mrb[136].mxu1 %vm59_vm4, %v2346_v8  ;;  %v2264_v7 = vld [vmem:[%s4822_s0 + $0x3a0] sm:$0xff] }
 0x118   :  { %2937 = vmatprep.mubr.msk.f32.mxu0 %vm3143_vm3, %v3144_v5  ;;  %3070 = vmatprep.mubr.msk.f32.mxu1 %vm3143_vm3, %v3144_v5  ;;  %v2262_v22 = vld [vmem:[%s4822_s0 + $0x390] sm:$0xff] }
 0x11a   :  { %v4117_v34 = vpop.f32.mrb[32].mxu0  ;;  %v4119_v35 = vpop.f32.mrb[32].mxu1 }
 0x11b   :  { %v2643_v43 = vpop.f32.mrb[33].mxu0  ;;  %v2776_v47 = vpop.f32.mrb[33].mxu1  ;;  %2938 = vmatmul.mubr.msk.f32.gmra.mrb[138].mxu0 %vm59_vm4, %v2260_v26  ;;  %3071 = vmatmul.mubr.msk.f32.gmra.mrb[138].mxu1 %vm59_vm4, %v2347_v33  ;;  %v2349_v26 = vld [vmem:[%s4822_s0 + $0x4e8] sm:$0xff] }
 0x11c   :  { %2940 = vmatprep.mubr.msk.f32.mxu0 %vm3143_vm3, %v3144_v5  ;;  %3073 = vmatprep.mubr.msk.f32.mxu1 %vm3143_vm3, %v3144_v5 }
 0x11e   :  { %v4135_v62 = vpop.f32.mrb[34].mxu0  ;;  %v4137_v63 = vpop.f32.mrb[34].mxu1 }
 0x11f   :  { %v2646_v8 = vpop.f32.mrb[35].mxu0  ;;  %v2779_v21 = vpop.f32.mrb[35].mxu1  ;;  %2941 = vmatmul.mubr.msk.f32.gmra.mrb[140].mxu0 %vm59_vm4, %v2261_v48  ;;  %3074 = vmatmul.mubr.msk.f32.gmra.mrb[140].mxu1 %vm59_vm4, %v2348_v49 }
 0x120   :  { %2943 = vmatprep.mubr.msk.f32.mxu0 %vm3143_vm3, %v3144_v5  ;;  %3076 = vmatprep.mubr.msk.f32.mxu1 %vm3143_vm3, %v3144_v5  ;;  %v2263_v8 = vld [vmem:[%s4822_s0 + $0x398] sm:$0xff]  ;;  %v2350_v21 = vld [vmem:[%s4822_s0 + $0x4f0] sm:$0xff] }
 0x122   :  { %v4153_v33 = vpop.f32.mrb[36].mxu0  ;;  %v4155_v43 = vpop.f32.mrb[36].mxu1 }
 0x123   :  { %v2649_v48 = vpop.f32.mrb[37].mxu0  ;;  %v2782_v49 = vpop.f32.mrb[37].mxu1  ;;  %2944 = vmatmul.mubr.msk.f32.gmra.mrb[142].mxu0 %vm59_vm4, %v2262_v22  ;;  %3077 = vmatmul.mubr.msk.f32.gmra.mrb[142].mxu1 %vm59_vm4, %v2349_v26  ;;  %v2351_v22 = vld [vmem:[%s4822_s0 + $0x4f8] sm:$0xff] }
 0x124   :  { %2946 = vmatprep.mubr.msk.f32.mxu0 %vm3143_vm3, %v3144_v5  ;;  %3079 = vmatprep.mubr.msk.f32.mxu1 %vm3143_vm3, %v3144_v5 }
 0x126   :  { %v4171_v48 = vpop.f32.mrb[38].mxu0  ;;  %v4173_v49 = vpop.f32.mrb[38].mxu1 }
 0x127   :  { %v2652_v26 = vpop.f32.mrb[39].mxu0  ;;  %v2785_v47 = vpop.f32.mrb[39].mxu1  ;;  %2947 = vmatmul.mubr.msk.f32.gmra.mrb[144].mxu0 %vm59_vm4, %v2263_v8  ;;  %3080 = vmatmul.mubr.msk.f32.gmra.mrb[144].mxu1 %vm59_vm4, %v2350_v21  ;;  %v2352_v8 = vld [vmem:[%s4822_s0 + $0x500] sm:$0xff] }
 0x128   :  { %2949 = vmatprep.mubr.msk.f32.mxu0 %vm3143_vm3, %v3144_v5  ;;  %3082 = vmatprep.mubr.msk.f32.mxu1 %vm3143_vm3, %v3144_v5 }
 0x12a   :  { %v4189_v26 = vpop.f32.mrb[40].mxu0  ;;  %v4191_v47 = vpop.f32.mrb[40].mxu1 }
 0x12b   :  { %v2655_v21 = vpop.f32.mrb[41].mxu0  ;;  %v2788_v36 = vpop.f32.mrb[41].mxu1  ;;  %2950 = vmatmul.mubr.msk.f32.gmra.mrb[146].mxu0 %vm59_vm4, %v2264_v7  ;;  %3083 = vmatmul.mubr.msk.f32.gmra.mrb[146].mxu1 %vm59_vm4, %v2351_v22  ;;  %v2353_v7 = vld [vmem:[%s4822_s0 + $0x508] sm:$0xff] }
 0x12c   :  { %2952 = vmatprep.mubr.msk.f32.mxu0 %vm3143_vm3, %v3144_v5  ;;  %3085 = vmatprep.mubr.msk.f32.mxu1 %vm3143_vm3, %v3144_v5 }
 0x12e   :  { %v4207_v21 = vpop.f32.mrb[42].mxu0  ;;  %v4209_v36 = vpop.f32.mrb[42].mxu1 }
 0x12f   :  { %v2658_v22 = vpop.f32.mrb[43].mxu0  ;;  %v2791_v61 = vpop.f32.mrb[43].mxu1  ;;  %2953 = vmatmul.mubr.msk.f32.gmra.mrb[148].mxu0 %vm59_vm4, %v2265_v20  ;;  %3086 = vmatmul.mubr.msk.f32.gmra.mrb[148].mxu1 %vm59_vm4, %v2352_v8  ;;  %v2354_v20 = vld [vmem:[%s4822_s0 + $0x510] sm:$0xff] }
 0x130   :  { %2955 = vmatprep.mubr.msk.f32.mxu0 %vm3143_vm3, %v3144_v5  ;;  %3088 = vmatprep.mubr.msk.f32.mxu1 %vm3143_vm3, %v3144_v5 }
 0x132   :  { %v4225_v22 = vpop.f32.mrb[44].mxu0  ;;  %v4227_v61 = vpop.f32.mrb[44].mxu1 }
 0x133   :  { %v2661_v8 = vpop.f32.mrb[45].mxu0  ;;  %v2794_v29 = vpop.f32.mrb[45].mxu1  ;;  %2956 = vmatmul.mubr.msk.f32.gmra.mrb[150].mxu0 %vm59_vm4, %v2266_v42  ;;  %3089 = vmatmul.mubr.msk.f32.gmra.mrb[150].mxu1 %vm59_vm4, %v2353_v7  ;;  %v2355_v42 = vld [vmem:[%s4822_s0 + $0x518] sm:$0xff] }
 0x134   :  { %2958 = vmatprep.mubr.msk.f32.mxu0 %vm3143_vm3, %v3144_v5  ;;  %3091 = vmatprep.mubr.msk.f32.mxu1 %vm3143_vm3, %v3144_v5 }
 0x136   :  { %v4243_v8 = vpop.f32.mrb[46].mxu0  ;;  %v4245_v29 = vpop.f32.mrb[46].mxu1 }
 0x137   :  { %v2664_v7 = vpop.f32.mrb[47].mxu0  ;;  %v2797_v6 = vpop.f32.mrb[47].mxu1  ;;  %2959 = vmatmul.mubr.msk.f32.gmra.mrb[152].mxu0 %vm59_vm4, %v2267_v19  ;;  %3092 = vmatmul.mubr.msk.f32.gmra.mrb[152].mxu1 %vm59_vm4, %v2354_v20  ;;  %v2356_v19 = vld [vmem:[%s4822_s0 + $0x520] sm:$0xff] }
 0x138   :  { %2961 = vmatprep.mubr.msk.f32.mxu0 %vm3143_vm3, %v3144_v5  ;;  %3094 = vmatprep.mubr.msk.f32.mxu1 %vm3143_vm3, %v3144_v5 }
 0x13a   :  { %v4261_v7 = vpop.f32.mrb[48].mxu0  ;;  %v4263_v6 = vpop.f32.mrb[48].mxu1 }
 0x13b   :  { %4864 = vst [vmem:[#allocation2_spill] sm:$0xff] %v4263_v6  ;;  %v2667_v20 = vpop.f32.mrb[49].mxu0  ;;  %v2800_v46 = vpop.f32.mrb[49].mxu1  ;;  %2962 = vmatmul.mubr.msk.f32.gmra.mrb[154].mxu0 %vm59_vm4, %v2268_v56  ;;  %3095 = vmatmul.mubr.msk.f32.gmra.mrb[154].mxu1 %vm59_vm4, %v2355_v42  ;;  %v2357_v56 = vld [vmem:[%s4822_s0 + $0x528] sm:$0xff] }
 0x13c   :  { %2964 = vmatprep.mubr.msk.f32.mxu0 %vm3143_vm3, %v3144_v5  ;;  %3097 = vmatprep.mubr.msk.f32.mxu1 %vm3143_vm3, %v3144_v5 }
 0x13e   :  { %v4279_v20 = vpop.f32.mrb[50].mxu0  ;;  %v4281_v46 = vpop.f32.mrb[50].mxu1 }
 0x13f   :  { %4865 = vst [vmem:[#allocation3_spill] sm:$0xff] %v4279_v20  ;;  %4866 = vst [vmem:[#allocation4_spill] sm:$0xff] %v4281_v46  ;;  %v2670_v42 = vpop.f32.mrb[51].mxu0  ;;  %v2803_v32 = vpop.f32.mrb[51].mxu1  ;;  %2965 = vmatmul.mubr.msk.f32.gmra.mrb[156].mxu0 %vm59_vm4, %v2269_v39  ;;  %3098 = vmatmul.mubr.msk.f32.gmra.mrb[156].mxu1 %vm59_vm4, %v2356_v19  ;;  %v2358_v39 = vld [vmem:[%s4822_s0 + $0x530] sm:$0xff] }
 0x140   :  { %2967 = vmatprep.mubr.msk.f32.mxu0 %vm3143_vm3, %v3144_v5  ;;  %3100 = vmatprep.mubr.msk.f32.mxu1 %vm3143_vm3, %v3144_v5 }
 0x142   :  { %v4297_v42 = vpop.f32.mrb[52].mxu0  ;;  %v4299_v32 = vpop.f32.mrb[52].mxu1 }
 0x143   :  { %4867 = vst [vmem:[#allocation5_spill] sm:$0xff] %v4297_v42  ;;  %4868 = vst [vmem:[#allocation6_spill] sm:$0xff] %v4299_v32  ;;  %v2673_v19 = vpop.f32.mrb[53].mxu0  ;;  %v2806_v18 = vpop.f32.mrb[53].mxu1  ;;  %2968 = vmatmul.mubr.msk.f32.gmra.mrb[158].mxu0 %vm59_vm4, %v2270_v25  ;;  %3101 = vmatmul.mubr.msk.f32.gmra.mrb[158].mxu1 %vm59_vm4, %v2357_v56  ;;  %v2359_v25 = vld [vmem:[%s4822_s0 + $0x538] sm:$0xff] }
 0x144   :  { %2970 = vmatprep.mubr.msk.f32.mxu0 %vm3143_vm3, %v3144_v5  ;;  %3103 = vmatprep.mubr.msk.f32.mxu1 %vm3143_vm3, %v3144_v5 }
 0x146   :  { %v4315_v19 = vpop.f32.mrb[54].mxu0  ;;  %v4317_v18 = vpop.f32.mrb[54].mxu1 }
 0x147   :  { %4869 = vst [vmem:[#allocation7_spill] sm:$0xff] %v4315_v19  ;;  %4870 = vst [vmem:[#allocation8_spill] sm:$0xff] %v4317_v18  ;;  %v2676_v56 = vpop.f32.mrb[55].mxu0  ;;  %v2809_v3 = vpop.f32.mrb[55].mxu1  ;;  %2971 = vmatmul.mubr.msk.f32.gmra.mrb[160].mxu0 %vm59_vm4, %v2271_v11  ;;  %3104 = vmatmul.mubr.msk.f32.gmra.mrb[160].mxu1 %vm59_vm4, %v2358_v39  ;;  %v2273_v18 = vld [vmem:[%s4822_s0 + $0x3e8] sm:$0xff]  ;;  %v2360_v11 = vld [vmem:[%s4822_s0 + $0x540] sm:$0xff] }
 0x148   :  { %2973 = vmatprep.mubr.msk.f32.mxu0 %vm3143_vm3, %v3144_v5  ;;  %3106 = vmatprep.mubr.msk.f32.mxu1 %vm3143_vm3, %v3144_v5 }
 0x14a   :  { %v4333_v56 = vpop.f32.mrb[56].mxu0  ;;  %v4335_v3 = vpop.f32.mrb[56].mxu1 }
 0x14b   :  { %4871 = vst [vmem:[#allocation9_spill] sm:$0xff] %v4333_v56  ;;  %4872 = vst [vmem:[#allocation10_spill] sm:$0xff] %v4335_v3  ;;  %v2679_v39 = vpop.f32.mrb[57].mxu0  ;;  %v2812_v53 = vpop.f32.mrb[57].mxu1  ;;  %2974 = vmatmul.mubr.msk.f32.gmra.mrb[162].mxu0 %vm59_vm4, %v2272_v60  ;;  %3107 = vmatmul.mubr.msk.f32.gmra.mrb[162].mxu1 %vm59_vm4, %v2359_v25  ;;  %v2274_v56 = vld [vmem:[%s4822_s0 + $0x3f0] sm:$0xff]  ;;  %v2361_v60 = vld [vmem:[%s4822_s0 + $0x548] sm:$0xff] }
 0x14c   :  { %2976 = vmatprep.mubr.msk.f32.mxu0 %vm3143_vm3, %v3144_v5  ;;  %3109 = vmatprep.mubr.msk.f32.mxu1 %vm3143_vm3, %v3144_v5 }
 0x14e   :  { %v4351_v39 = vpop.f32.mrb[58].mxu0  ;;  %v4353_v53 = vpop.f32.mrb[58].mxu1 }
 0x14f   :  { %4873 = vst [vmem:[#allocation11_spill] sm:$0xff] %v4351_v39  ;;  %4874 = vst [vmem:[#allocation12_spill] sm:$0xff] %v4353_v53  ;;  %v2682_v25 = vpop.f32.mrb[59].mxu0  ;;  %v2815_v3 = vpop.f32.mrb[59].mxu1  ;;  %2977 = vmatmul.mubr.msk.f32.gmra.mrb[164].mxu0 %vm59_vm4, %v2273_v18  ;;  %3110 = vmatmul.mubr.msk.f32.gmra.mrb[164].mxu1 %vm59_vm4, %v2360_v11  ;;  %v2275_v39 = vld [vmem:[%s4822_s0 + $0x3f8] sm:$0xff]  ;;  %v2362_v18 = vld [vmem:[%s4822_s0 + $0x550] sm:$0xff] }
 0x150   :  { %2979 = vmatprep.mubr.msk.f32.mxu0 %vm3143_vm3, %v3144_v5  ;;  %3112 = vmatprep.mubr.msk.f32.mxu1 %vm3143_vm3, %v3144_v5 }
 0x152   :  { %v4369_v25 = vpop.f32.mrb[60].mxu0  ;;  %v4371_v3 = vpop.f32.mrb[60].mxu1 }
 0x153   :  { %4875 = vst [vmem:[#allocation13_spill] sm:$0xff] %v4369_v25  ;;  %4876 = vst [vmem:[#allocation14_spill] sm:$0xff] %v4371_v3  ;;  %v2685_v11 = vpop.f32.mrb[61].mxu0  ;;  %v2818_v53 = vpop.f32.mrb[61].mxu1  ;;  %2980 = vmatmul.mubr.msk.f32.gmra.mrb[166].mxu0 %vm59_vm4, %v2274_v56  ;;  %3113 = vmatmul.mubr.msk.f32.gmra.mrb[166].mxu1 %vm59_vm4, %v2361_v60  ;;  %v2276_v25 = vld [vmem:[%s4822_s0 + $0x400] sm:$0x3] }
 0x154   :  { %2982 = vmatprep.mubr.msk.f32.mxu0 %vm3143_vm3, %v3144_v5  ;;  %3115 = vmatprep.mubr.msk.f32.mxu1 %vm3143_vm3, %v3144_v5  ;;  %v2363_v56 = vld [vmem:[%s4822_s0 + $0x558] sm:$0x3] }
 0x156   :  { %v4387_v11 = vpop.f32.mrb[62].mxu0  ;;  %v4389_v53 = vpop.f32.mrb[62].mxu1 }
 0x157   :  { %4877 = vst [vmem:[#allocation15_spill] sm:$0xff] %v4387_v11  ;;  %4878 = vst [vmem:[#allocation16_spill] sm:$0xff] %v4389_v53  ;;  %v2688_v60 = vpop.f32.mrb[63].mxu0  ;;  %v2821_v3 = vpop.f32.mrb[63].mxu1  ;;  %2983 = vmatmul.mubr.msk.f32.gmra.mrb[168].mxu0 %vm59_vm4, %v2275_v39  ;;  %3116 = vmatmul.mubr.msk.f32.gmra.mrb[168].mxu1 %vm59_vm4, %v2362_v18 }
 0x158   :  { %2985 = vmatprep.mubr.msk.f32.mxu0 %vm3143_vm3, %v3144_v5  ;;  %3118 = vmatprep.mubr.msk.f32.mxu1 %vm3143_vm3, %v3144_v5 }
 0x15a   :  { %v4405_v60 = vpop.f32.mrb[64].mxu0  ;;  %v4407_v3 = vpop.f32.mrb[64].mxu1 }
 0x15b   :  { %4879 = vst [vmem:[#allocation17_spill] sm:$0xff] %v4405_v60  ;;  %4880 = vst [vmem:[#allocation18_spill] sm:$0xff] %v4407_v3  ;;  %v2691_v18 = vpop.f32.mrb[65].mxu0  ;;  %v2824_v53 = vpop.f32.mrb[65].mxu1  ;;  %2986 = vmatmul.mubr.msk.f32.gmra.mrb[170].mxu0 %vm59_vm4, %v2276_v25  ;;  %3119 = vmatmul.mubr.msk.f32.gmra.mrb[170].mxu1 %vm59_vm4, %v2363_v56 }
 0x15e   :  { %v4413_v5 = vpop.f32.mrb[66].mxu0  ;;  %v4415_v11 = vpop.f32.mrb[66].mxu1 }
 0x15f   :  { %4881 = vst [vmem:[#allocation19_spill] sm:$0xff] %v4413_v5  ;;  %4882 = vst [vmem:[#allocation20_spill] sm:$0xff] %v4415_v11  ;;  %v2694_v32 = vpop.f32.mrb[67].mxu0  ;;  %v2827_v42 = vpop.f32.mrb[67].mxu1 }
 0x162   :  { %v4419_v46 = vpop.f32.mrb[68].mxu0  ;;  %v4421_v20 = vpop.f32.mrb[68].mxu1 }
 0x163   :  { %4883 = vst [vmem:[#allocation21_spill] sm:$0xff] %v4419_v46  ;;  %4884 = vst [vmem:[#allocation22_spill] sm:$0xff] %v4421_v20  ;;  %v2697_v18 = vpop.f32.mrb[69].mxu0  ;;  %v2830_v25 = vpop.f32.mrb[69].mxu1 }
 0x166   :  { %v4425_v39 = vpop.f32.mrb[70].mxu0  ;;  %v4427_v56 = vpop.f32.mrb[70].mxu1 }
 0x167   :  { %4885 = vst [vmem:[#allocation23_spill] sm:$0xff] %v4425_v39  ;;  %4886 = vst [vmem:[#allocation24_spill] sm:$0xff] %v4427_v56  ;;  %v2700_v60 = vpop.f32.mrb[71].mxu0  ;;  %v2833_v19 = vpop.f32.mrb[71].mxu1 }
 0x16a   :  { %v4431_v32 = vpop.f32.mrb[72].mxu0  ;;  %v4433_v42 = vpop.f32.mrb[72].mxu1 }
 0x16b   :  { %4887 = vst [vmem:[#allocation25_spill] sm:$0xff] %v4431_v32  ;;  %4888 = vst [vmem:[#allocation26_spill] sm:$0xff] %v4433_v42  ;;  %v2703_v5 = vpop.f32.mrb[73].mxu0  ;;  %v2836_v53 = vpop.f32.mrb[73].mxu1 }
 0x16e   :  { %v4437_v18 = vpop.f32.mrb[74].mxu0  ;;  %v4439_v25 = vpop.f32.mrb[74].mxu1 }
 0x16f   :  { %4889 = vst [vmem:[#allocation27_spill] sm:$0xff] %v4437_v18  ;;  %4890 = vst [vmem:[#allocation28_spill] sm:$0xff] %v4439_v25  ;;  %v2706_v46 = vpop.f32.mrb[75].mxu0  ;;  %v2839_v3 = vpop.f32.mrb[75].mxu1 }
 0x172   :  { %v4443_v60 = vpop.f32.mrb[76].mxu0  ;;  %v4445_v19 = vpop.f32.mrb[76].mxu1 }
 0x173   :  { %4891 = vst [vmem:[#allocation29_spill] sm:$0xff] %v4443_v60  ;;  %4892 = vst [vmem:[#allocation30_spill] sm:$0xff] %v4445_v19  ;;  %v2709_v39 = vpop.f32.mrb[77].mxu0  ;;  %v2842_v11 = vpop.f32.mrb[77].mxu1  ;;  %v4476_v19 = vld [vmem:[%s4823_s2] ss:$0 sm:$0xff] }
 0x176   :  { %v4449_v5 = vpop.f32.mrb[78].mxu0  ;;  %v4451_v53 = vpop.f32.mrb[78].mxu1 }
 0x177   :  { %4893 = vst [vmem:[#allocation31_spill] sm:$0xff] %v4449_v5  ;;  %4894 = vst [vmem:[#allocation32_spill] sm:$0xff] %v4451_v53  ;;  %v2712_v32 = vpop.f32.mrb[79].mxu0  ;;  %v2845_v20 = vpop.f32.mrb[79].mxu1 }
 0x17a   :  { %v4455_v46 = vpop.f32.mrb[80].mxu0  ;;  %v4457_v3 = vpop.f32.mrb[80].mxu1 }
 0x17b   :  { %4895 = vst [vmem:[#allocation33_spill] sm:$0xff] %v4455_v46  ;;  %4896 = vst [vmem:[#allocation34_spill] sm:$0xff] %v4457_v3  ;;  %v2715_v18 = vpop.f32.mrb[81].mxu0  ;;  %v2848_v56 = vpop.f32.mrb[81].mxu1 }
 0x17e   :  { %v4461_v39 = vpop.f32.mrb[82].mxu0  ;;  %v4463_v11 = vpop.f32.mrb[82].mxu1 }
 0x17f   :  { %4897 = vst [vmem:[#allocation35_spill] sm:$0xff] %v4461_v39  ;;  %4898 = vst [vmem:[#allocation36_spill] sm:$0xff] %v4463_v11  ;;  %v2718_v60 = vpop.f32.mrb[83].mxu0  ;;  %v2851_v42 = vpop.f32.mrb[83].mxu1 }
 0x180   :  { %v4901_v42 = vmax.f32 %v3829_v51, %v3831_v52 }
 0x182   :  { %v4467_v32 = vpop.f32.mrb[84].mxu0  ;;  %v4469_v20 = vpop.f32.mrb[84].mxu1 }
 0x183   :  { %4899 = vst [vmem:[#allocation37_spill] sm:$0xff] %v4467_v32  ;;  %4900 = vst [vmem:[#allocation38_spill] sm:$0xff] %v4469_v20  ;;  %v2721_v5 = vpop.f32.mrb[85].mxu0  ;;  %v2854_v25 = vpop.f32.mrb[85].mxu1 }
 0x186   :  { %v1165_v18 = vpop.f32.mrb[86].mxu0  ;;  %v1618_v56 = vpop.f32.mrb[86].mxu1 }
 0x187   :  { %v1875_v3 = vmax.f32 %v1165_v18, %v1618_v56  ;;  %v2861_v46 = vpop.f32.mrb[87].mxu0  ;;  %v2994_v6 = vpop.f32.mrb[87].mxu1 }
 0x188   :  { %v4902_v6 = vmax.f32 %v3847_v58, %v3849_v59 }
 0x189   :  { %v1918_v60 = vmax.f32 %v4901_v42, %v1875_v3 }
 0x18a   :  { %v1170_v11 = vpop.f32.mrb[88].mxu0  ;;  %v1623_v39 = vpop.f32.mrb[88].mxu1 }
 0x18b   :  { %v1968_v53 = vadd.f32 %v4476_v19, %v1918_v60  ;;  %v1876_v5 = vmax.f32 %v1170_v11, %v1623_v39  ;;  %v2864_v25 = vpop.f32.mrb[89].mxu0  ;;  %v2997_v20 = vpop.f32.mrb[89].mxu1 }
 0x18d   :  { %v2011_v18 = vmax.f32 %v1968_v53, 0.0  ;;  %v1919_v46 = vmax.f32 %v4902_v6, %v1876_v5  ;;  %v4903_v53 = vmax.f32 %v3865_v1, %v3867_v2 }
 0x18e   :  { %v1175_v56 = vpop.f32.mrb[90].mxu0  ;;  %v1628_v32 = vpop.f32.mrb[90].mxu1 }
 0x18f   :  { %2055 = vst.msk [vmem:[%s4824_s3] sm:$0xff] %vm2054_vm5, %v2011_v18  ;;  %v1969_v51 = vadd.f32 %v4476_v19, %v1919_v46  ;;  %v1877_v52 = vmax.f32 %v1175_v56, %v1628_v32  ;;  %v2867_v3 = vpop.f32.mrb[91].mxu0  ;;  %v3000_v39 = vpop.f32.mrb[91].mxu1  ;;  %v4904_v18 = vmax.f32 %v3883_v9, %v3885_v10 }
 0x190   :  { %v4905_v39 = vmax.f32 %v3901_v16, %v3903_v17 }
 0x191   :  { %v2012_v11 = vmax.f32 %v1969_v51, 0.0  ;;  %v1920_v20 = vmax.f32 %v4903_v53, %v1877_v52 }
 0x192   :  { %v1180_v42 = vpop.f32.mrb[92].mxu0  ;;  %v1633_v58 = vpop.f32.mrb[92].mxu1 }
 0x193   :  { %2056 = vst.msk [vmem:[%s4824_s3 + $0x8] sm:$0xff] %vm2054_vm5, %v2012_v11  ;;  %v1970_v59 = vadd.f32 %v4476_v19, %v1920_v20  ;;  %v1878_v60 = vmax.f32 %v1180_v42, %v1633_v58  ;;  %v2870_v5 = vpop.f32.mrb[93].mxu0  ;;  %v3003_v25 = vpop.f32.mrb[93].mxu1 }
 0x195   :  { %v2013_v32 = vmax.f32 %v1970_v59, 0.0  ;;  %v1921_v6 = vmax.f32 %v4904_v18, %v1878_v60  ;;  %v4906_v60 = vmax.f32 %v3919_v23, %v3921_v24 }
 0x196   :  { %v1185_v46 = vpop.f32.mrb[94].mxu0  ;;  %v1638_v1 = vpop.f32.mrb[94].mxu1 }
 0x197   :  { %2057 = vst.msk [vmem:[%s4824_s3 + $0x10] sm:$0xff] %vm2054_vm5, %v2013_v32  ;;  %v1971_v2 = vadd.f32 %v4476_v19, %v1921_v6  ;;  %v1879_v56 = vmax.f32 %v1185_v46, %v1638_v1  ;;  %v2873_v51 = vpop.f32.mrb[95].mxu0  ;;  %v3006_v52 = vpop.f32.mrb[95].mxu1  ;;  %v4907_v1 = vmax.f32 %v3937_v30, %v3939_v31 }
 0x199   :  { %v2014_v3 = vmax.f32 %v1971_v2, 0.0  ;;  %v1922_v11 = vmax.f32 %v4905_v39, %v1879_v56 }
 0x19a   :  { %v1190_v53 = vpop.f32.mrb[96].mxu0  ;;  %v1643_v9 = vpop.f32.mrb[96].mxu1 }
 0x19b   :  { %2058 = vst.msk [vmem:[%s4824_s3 + $0x18] sm:$0xff] %vm2054_vm5, %v2014_v3  ;;  %v1972_v10 = vadd.f32 %v4476_v19, %v1922_v11  ;;  %v1880_v20 = vmax.f32 %v1190_v53, %v1643_v9  ;;  %v2876_v42 = vpop.f32.mrb[97].mxu0  ;;  %v3009_v58 = vpop.f32.mrb[97].mxu1  ;;  %v4908_v11 = vmax.f32 %v3955_v37, %v3957_v38 }
 0x19d   :  { %v2015_v59 = vmax.f32 %v1972_v10, 0.0  ;;  %v1923_v5 = vmax.f32 %v4906_v60, %v1880_v20 }
 0x19e   :  { %v1195_v25 = vpop.f32.mrb[98].mxu0  ;;  %v1648_v16 = vpop.f32.mrb[98].mxu1 }
 0x19f   :  { %2059 = vst.msk [vmem:[%s4824_s3 + $0x20] sm:$0xff] %vm2054_vm5, %v2015_v59  ;;  %v1973_v17 = vadd.f32 %v4476_v19, %v1923_v5  ;;  %v1881_v32 = vmax.f32 %v1195_v25, %v1648_v16  ;;  %v2879_v18 = vpop.f32.mrb[99].mxu0  ;;  %v3012_v6 = vpop.f32.mrb[99].mxu1  ;;  %v4909_v59 = vmax.f32 %v3973_v44, %v3975_v45 }
 0x1a0   :  { %v4910_v18 = vmax.f32 %v3991_v54, %v3993_v55 }
 0x1a1   :  { %v2016_v46 = vmax.f32 %v1973_v17, 0.0  ;;  %v1924_v2 = vmax.f32 %v4907_v1, %v1881_v32 }
 0x1a2   :  { %v1200_v56 = vpop.f32.mrb[100].mxu0  ;;  %v1653_v23 = vpop.f32.mrb[100].mxu1 }
 0x1a3   :  { %2060 = vst.msk [vmem:[%s4824_s3 + $0x28] sm:$0xff] %vm2054_vm5, %v2016_v46  ;;  %v1974_v24 = vadd.f32 %v4476_v19, %v1924_v2  ;;  %v1882_v51 = vmax.f32 %v1200_v56, %v1653_v23  ;;  %v2882_v52 = vpop.f32.mrb[101].mxu0  ;;  %v3015_v3 = vpop.f32.mrb[101].mxu1 }
 0x1a5   :  { %v2017_v39 = vmax.f32 %v1974_v24, 0.0  ;;  %v1925_v53 = vmax.f32 %v4908_v11, %v1882_v51  ;;  %v4911_v24 = vmax.f32 %v4009_v0, %v4011_v4 }
 0x1a6   :  { %v1205_v9 = vpop.f32.mrb[102].mxu0  ;;  %v1658_v30 = vpop.f32.mrb[102].mxu1 }
 0x1a7   :  { %2061 = vst.msk [vmem:[%s4824_s3 + $0x30] sm:$0xff] %vm2054_vm5, %v2017_v39  ;;  %v1975_v31 = vadd.f32 %v4476_v19, %v1925_v53  ;;  %v1883_v10 = vmax.f32 %v1205_v9, %v1658_v30  ;;  %v2885_v20 = vpop.f32.mrb[103].mxu0  ;;  %v3018_v42 = vpop.f32.mrb[103].mxu1  ;;  %v4912_v9 = vmax.f32 %v4027_v14, %v4029_v15 }
 0x1a9   :  { %v2018_v58 = vmax.f32 %v1975_v31, 0.0  ;;  %v1926_v60 = vmax.f32 %v4909_v59, %v1883_v10  ;;  %v4913_v59 = vmax.f32 %v4045_v27, %v4047_v28 }
 0x1aa   :  { %v1210_v5 = vpop.f32.mrb[104].mxu0  ;;  %v1663_v37 = vpop.f32.mrb[104].mxu1 }
 0x1ab   :  { %2062 = vst.msk [vmem:[%s4824_s3 + $0x38] sm:$0xff] %vm2054_vm5, %v2018_v58  ;;  %v1976_v38 = vadd.f32 %v4476_v19, %v1926_v60  ;;  %v1884_v25 = vmax.f32 %v1210_v5, %v1663_v37  ;;  %v2888_v16 = vpop.f32.mrb[105].mxu0  ;;  %v3021_v17 = vpop.f32.mrb[105].mxu1 }
 0x1ac   :  { %v4914_v17 = vmax.f32 %v4063_v40, %v4065_v41 }
 0x1ad   :  { %v2019_v32 = vmax.f32 %v1976_v38, 0.0  ;;  %v1927_v6 = vmax.f32 %v4910_v18, %v1884_v25 }
 0x1ae   :  { %v1215_v46 = vpop.f32.mrb[106].mxu0  ;;  %v1668_v44 = vpop.f32.mrb[106].mxu1 }
 0x1af   :  { %2063 = vst.msk [vmem:[%s4824_s3 + $0x40] sm:$0xff] %vm2054_vm5, %v2019_v32  ;;  %v1977_v45 = vadd.f32 %v4476_v19, %v1927_v6  ;;  %v1885_v1 = vmax.f32 %v1215_v46, %v1668_v44  ;;  %v2891_v2 = vpop.f32.mrb[107].mxu0  ;;  %v3024_v56 = vpop.f32.mrb[107].mxu1 }
 0x1b1   :  { %v2020_v23 = vmax.f32 %v1977_v45, 0.0  ;;  %v1928_v51 = vmax.f32 %v4911_v24, %v1885_v1  ;;  %v4915_v1 = vmax.f32 %v4081_v50, %v4083_v57 }
 0x1b2   :  { %v1220_v52 = vpop.f32.mrb[108].mxu0  ;;  %v1673_v54 = vpop.f32.mrb[108].mxu1 }
 0x1b3   :  { %2064 = vst.msk [vmem:[%s4824_s3 + $0x48] sm:$0xff] %vm2054_vm5, %v2020_v23  ;;  %v1978_v55 = vadd.f32 %v4476_v19, %v1928_v51  ;;  %v1886_v3 = vmax.f32 %v1220_v52, %v1673_v54  ;;  %v2894_v39 = vpop.f32.mrb[109].mxu0  ;;  %v3027_v11 = vpop.f32.mrb[109].mxu1  ;;  %v4916_v54 = vmax.f32 %v4099_v12, %v4101_v13 }
 0x1b5   :  { %v2021_v53 = vmax.f32 %v1978_v55, 0.0  ;;  %v1929_v30 = vmax.f32 %v4912_v9, %v1886_v3 }
 0x1b6   :  { %v1225_v31 = vpop.f32.mrb[110].mxu0  ;;  %v1678_v0 = vpop.f32.mrb[110].mxu1 }
 0x1b7   :  { %2065 = vst.msk [vmem:[%s4824_s3 + $0x50] sm:$0xff] %vm2054_vm5, %v2021_v53  ;;  %v1979_v4 = vadd.f32 %v4476_v19, %v1929_v30  ;;  %v1887_v10 = vmax.f32 %v1225_v31, %v1678_v0  ;;  %v2897_v20 = vpop.f32.mrb[111].mxu0  ;;  %v3030_v42 = vpop.f32.mrb[111].mxu1  ;;  %v4917_v30 = vmax.f32 %v4117_v34, %v4119_v35 }
 0x1b9   :  { %v2022_v58 = vmax.f32 %v1979_v4, 0.0  ;;  %v1930_v60 = vmax.f32 %v4913_v59, %v1887_v10 }
 0x1ba   :  { %v1230_v5 = vpop.f32.mrb[112].mxu0  ;;  %v1683_v14 = vpop.f32.mrb[112].mxu1 }
 0x1bb   :  { %2066 = vst.msk [vmem:[%s4824_s3 + $0x58] sm:$0xff] %vm2054_vm5, %v2022_v58  ;;  %v1980_v15 = vadd.f32 %v4476_v19, %v1930_v60  ;;  %v1888_v37 = vmax.f32 %v1230_v5, %v1683_v14  ;;  %v2900_v38 = vpop.f32.mrb[113].mxu0  ;;  %v3033_v25 = vpop.f32.mrb[113].mxu1  ;;  %v4918_v58 = vmax.f32 %v4135_v62, %v4137_v63 }
 0x1bc   :  { %v4919_v38 = vmax.f32 %v4153_v33, %v4155_v43 }
 0x1bd   :  { %v2023_v16 = vmax.f32 %v1980_v15, 0.0  ;;  %v1931_v32 = vmax.f32 %v4914_v17, %v1888_v37 }
 0x1be   :  { %v1235_v18 = vpop.f32.mrb[114].mxu0  ;;  %v1688_v27 = vpop.f32.mrb[114].mxu1 }
 0x1bf   :  { %2067 = vst.msk [vmem:[%s4824_s3 + $0x60] sm:$0xff] %vm2054_vm5, %v2023_v16  ;;  %v1981_v28 = vadd.f32 %v4476_v19, %v1931_v32  ;;  %v1889_v6 = vmax.f32 %v1235_v18, %v1688_v27  ;;  %v2903_v46 = vpop.f32.mrb[115].mxu0  ;;  %v3036_v44 = vpop.f32.mrb[115].mxu1 }
 0x1c1   :  { %v2024_v45 = vmax.f32 %v1981_v28, 0.0  ;;  %v1932_v2 = vmax.f32 %v4915_v1, %v1889_v6  ;;  %v4920_v28 = vmax.f32 %v4171_v48, %v4173_v49 }
 0x1c2   :  { %v1240_v56 = vpop.f32.mrb[116].mxu0  ;;  %v1693_v40 = vpop.f32.mrb[116].mxu1 }
 0x1c3   :  { %2068 = vst.msk [vmem:[%s4824_s3 + $0x68] sm:$0xff] %vm2054_vm5, %v2024_v45  ;;  %v1982_v41 = vadd.f32 %v4476_v19, %v1932_v2  ;;  %v1890_v23 = vmax.f32 %v1240_v56, %v1693_v40  ;;  %v2906_v24 = vpop.f32.mrb[117].mxu0  ;;  %v3039_v51 = vpop.f32.mrb[117].mxu1  ;;  %v4921_v56 = vmax.f32 %v4189_v26, %v4191_v47 }
 0x1c5   :  { %v2025_v52 = vmax.f32 %v1982_v41, 0.0  ;;  %v1933_v55 = vmax.f32 %v4916_v54, %v1890_v23  ;;  %v4922_v54 = vmax.f32 %v4207_v21, %v4209_v36 }
 0x1c6   :  { %v1245_v3 = vpop.f32.mrb[118].mxu0  ;;  %v1698_v50 = vpop.f32.mrb[118].mxu1 }
 0x1c7   :  { %2069 = vst.msk [vmem:[%s4824_s3 + $0x70] sm:$0xff] %vm2054_vm5, %v2025_v52  ;;  %v1983_v57 = vadd.f32 %v4476_v19, %v1933_v55  ;;  %v1891_v39 = vmax.f32 %v1245_v3, %v1698_v50  ;;  %v2909_v11 = vpop.f32.mrb[119].mxu0  ;;  %v3042_v53 = vpop.f32.mrb[119].mxu1 }
 0x1c8   :  { %v4923_v53 = vmax.f32 %v4225_v22, %v4227_v61 }
 0x1c9   :  { %v2026_v9 = vmax.f32 %v1983_v57, 0.0  ;;  %v1934_v31 = vmax.f32 %v4917_v30, %v1891_v39 }
 0x1ca   :  { %v1250_v0 = vpop.f32.mrb[120].mxu0  ;;  %v1703_v12 = vpop.f32.mrb[120].mxu1 }
 0x1cb   :  { %2070 = vst.msk [vmem:[%s4824_s3 + $0x78] sm:$0xff] %vm2054_vm5, %v2026_v9  ;;  %v1984_v13 = vadd.f32 %v4476_v19, %v1934_v31  ;;  %v1892_v4 = vmax.f32 %v1250_v0, %v1703_v12  ;;  %v2912_v10 = vpop.f32.mrb[121].mxu0  ;;  %v3045_v20 = vpop.f32.mrb[121].mxu1 }
 0x1cd   :  { %v2027_v42 = vmax.f32 %v1984_v13, 0.0  ;;  %v1935_v59 = vmax.f32 %v4918_v58, %v1892_v4  ;;  %v4924_v4 = vmax.f32 %v4243_v8, %v4245_v29 }
 0x1ce   :  { %v1255_v60 = vpop.f32.mrb[122].mxu0  ;;  %v1708_v34 = vpop.f32.mrb[122].mxu1 }
 0x1cf   :  { %2071 = vst.msk [vmem:[%s4824_s3 + $0x80] sm:$0xff] %vm2054_vm5, %v2027_v42  ;;  %v1985_v35 = vadd.f32 %v4476_v19, %v1935_v59  ;;  %v1893_v5 = vmax.f32 %v1255_v60, %v1708_v34  ;;  %v2915_v14 = vpop.f32.mrb[123].mxu0  ;;  %v3048_v15 = vpop.f32.mrb[123].mxu1  ;;  %v4925_v34 = vld [vmem:[#allocation2_spill] sm:$0xff] }
 0x1d1   :  { %v2028_v37 = vmax.f32 %v1985_v35, 0.0  ;;  %v1936_v25 = vmax.f32 %v4919_v38, %v1893_v5  ;;  %v4926_v35 = vmax.f32 %v4261_v7, %v4925_v34 }
 0x1d2   :  { %v1260_v16 = vpop.f32.mrb[124].mxu0  ;;  %v1713_v62 = vpop.f32.mrb[124].mxu1 }
 0x1d3   :  { %2072 = vst.msk [vmem:[%s4824_s3 + $0x88] sm:$0xff] %vm2054_vm5, %v2028_v37  ;;  %v1986_v63 = vadd.f32 %v4476_v19, %v1936_v25  ;;  %v1894_v17 = vmax.f32 %v1260_v16, %v1713_v62  ;;  %v2918_v32 = vpop.f32.mrb[125].mxu0  ;;  %v3051_v18 = vpop.f32.mrb[125].mxu1  ;;  %v4927_v16 = vld [vmem:[#allocation3_spill] sm:$0xff]  ;;  %v4928_v62 = vld [vmem:[#allocation4_spill] sm:$0xff] }
 0x1d5   :  { %v2029_v27 = vmax.f32 %v1986_v63, 0.0  ;;  %v1937_v6 = vmax.f32 %v4920_v28, %v1894_v17  ;;  %v4929_v63 = vmax.f32 %v4927_v16, %v4928_v62 }
 0x1d6   :  { %v1265_v46 = vpop.f32.mrb[126].mxu0  ;;  %v1718_v33 = vpop.f32.mrb[126].mxu1 }
 0x1d7   :  { %2073 = vst.msk [vmem:[%s4824_s3 + $0x90] sm:$0xff] %vm2054_vm5, %v2029_v27  ;;  %v1987_v43 = vadd.f32 %v4476_v19, %v1937_v6  ;;  %v1895_v44 = vmax.f32 %v1265_v46, %v1718_v33  ;;  %v2921_v45 = vpop.f32.mrb[127].mxu0  ;;  %v3054_v1 = vpop.f32.mrb[127].mxu1  ;;  %v4930_v33 = vld [vmem:[#allocation5_spill] sm:$0xff] }
 0x1d9   :  { %v2030_v2 = vmax.f32 %v1987_v43, 0.0  ;;  %v1938_v40 = vmax.f32 %v4921_v56, %v1895_v44  ;;  %v4931_v43 = vld [vmem:[#allocation6_spill] sm:$0xff] }
 0x1da   :  { %v1270_v41 = vpop.f32.mrb[128].mxu0  ;;  %v1723_v48 = vpop.f32.mrb[128].mxu1  ;;  %v4932_v44 = vmax.f32 %v4930_v33, %v4931_v43 }
 0x1db   :  { %2074 = vst.msk [vmem:[%s4824_s3 + $0x98] sm:$0xff] %vm2054_vm5, %v2030_v2  ;;  %v1988_v49 = vadd.f32 %v4476_v19, %v1938_v40  ;;  %v1896_v23 = vmax.f32 %v1270_v41, %v1723_v48  ;;  %v2924_v24 = vpop.f32.mrb[129].mxu0  ;;  %v3057_v51 = vpop.f32.mrb[129].mxu1 }
 0x1dc   :  { %v4934_v24 = vld [vmem:[#allocation8_spill] sm:$0xff] }
 0x1dd   :  { %v2031_v52 = vmax.f32 %v1988_v49, 0.0  ;;  %v1939_v55 = vmax.f32 %v4922_v54, %v1896_v23  ;;  %v4933_v23 = vld [vmem:[#allocation7_spill] sm:$0xff] }
 0x1de   :  { %v1275_v3 = vpop.f32.mrb[130].mxu0  ;;  %v1728_v26 = vpop.f32.mrb[130].mxu1  ;;  %v4935_v51 = vmax.f32 %v4933_v23, %v4934_v24 }
 0x1df   :  { %2075 = vst.msk [vmem:[%s4824_s3 + $0xa0] sm:$0xff] %vm2054_vm5, %v2031_v52  ;;  %v1989_v47 = vadd.f32 %v4476_v19, %v1939_v55  ;;  %v1897_v50 = vmax.f32 %v1275_v3, %v1728_v26  ;;  %v2927_v57 = vpop.f32.mrb[131].mxu0  ;;  %v3060_v39 = vpop.f32.mrb[131].mxu1 }
 0x1e0   :  { %v4936_v39 = vld [vmem:[#allocation9_spill] sm:$0xff] }
 0x1e1   :  { %v2032_v11 = vmax.f32 %v1989_v47, 0.0  ;;  %v1940_v9 = vmax.f32 %v4923_v53, %v1897_v50 }
 0x1e2   :  { %v1280_v30 = vpop.f32.mrb[132].mxu0  ;;  %v1733_v21 = vpop.f32.mrb[132].mxu1 }
 0x1e3   :  { %2076 = vst.msk [vmem:[%s4824_s3 + $0xa8] sm:$0xff] %vm2054_vm5, %v2032_v11  ;;  %v1990_v36 = vadd.f32 %v4476_v19, %v1940_v9  ;;  %v1898_v31 = vmax.f32 %v1280_v30, %v1733_v21  ;;  %v2930_v0 = vpop.f32.mrb[133].mxu0  ;;  %v3063_v12 = vpop.f32.mrb[133].mxu1  ;;  %v4937_v11 = vld [vmem:[#allocation10_spill] sm:$0xff] }
 0x1e4   :  { %v4938_v53 = vmax.f32 %v4936_v39, %v4937_v11 }
 0x1e5   :  { %v2033_v13 = vmax.f32 %v1990_v36, 0.0  ;;  %v1941_v10 = vmax.f32 %v4924_v4, %v1898_v31  ;;  %v4939_v4 = vld [vmem:[#allocation11_spill] sm:$0xff] }
 0x1e6   :  { %v1285_v20 = vpop.f32.mrb[134].mxu0  ;;  %v1738_v22 = vpop.f32.mrb[134].mxu1 }
 0x1e7   :  { %2077 = vst.msk [vmem:[%s4824_s3 + $0xb0] sm:$0xff] %vm2054_vm5, %v2033_v13  ;;  %v1991_v61 = vadd.f32 %v4476_v19, %v1941_v10  ;;  %v1899_v42 = vmax.f32 %v1285_v20, %v1738_v22  ;;  %v2933_v58 = vpop.f32.mrb[135].mxu0  ;;  %v3066_v59 = vpop.f32.mrb[135].mxu1  ;;  %v4940_v10 = vld [vmem:[#allocation12_spill] sm:$0xff] }
 0x1e8   :  { %v4941_v20 = vmax.f32 %v4939_v4, %v4940_v10 }
 0x1e9   :  { %v2034_v60 = vmax.f32 %v1991_v61, 0.0  ;;  %v1942_v5 = vmax.f32 %v4926_v35, %v1899_v42 }
 0x1ea   :  { %v1290_v14 = vpop.f32.mrb[136].mxu0  ;;  %v1743_v8 = vpop.f32.mrb[136].mxu1 }
 0x1eb   :  { %2078 = vst.msk [vmem:[%s4824_s3 + $0xb8] sm:$0xff] %vm2054_vm5, %v2034_v60  ;;  %v1992_v29 = vadd.f32 %v4476_v19, %v1942_v5  ;;  %v1900_v15 = vmax.f32 %v1290_v14, %v1743_v8  ;;  %v2936_v37 = vpop.f32.mrb[137].mxu0  ;;  %v3069_v38 = vpop.f32.mrb[137].mxu1  ;;  %v4942_v5 = vld [vmem:[#allocation13_spill] sm:$0xff]  ;;  %v4943_v14 = vld [vmem:[#allocation14_spill] sm:$0xff] }
 0x1ec   :  { %v4944_v8 = vmax.f32 %v4942_v5, %v4943_v14 }
 0x1ed   :  { %v2035_v25 = vmax.f32 %v1992_v29, 0.0  ;;  %v1943_v17 = vmax.f32 %v4929_v63, %v1900_v15 }
 0x1ee   :  { %v1295_v32 = vpop.f32.mrb[138].mxu0  ;;  %v1748_v7 = vpop.f32.mrb[138].mxu1 }
 0x1ef   :  { %2079 = vst.msk [vmem:[%s4824_s3 + $0xc0] sm:$0xff] %vm2054_vm5, %v2035_v25  ;;  %v1993_v18 = vadd.f32 %v4476_v19, %v1943_v17  ;;  %v1901_v27 = vmax.f32 %v1295_v32, %v1748_v7  ;;  %v2939_v28 = vpop.f32.mrb[139].mxu0  ;;  %v3072_v6 = vpop.f32.mrb[139].mxu1  ;;  %v4945_v17 = vld [vmem:[#allocation15_spill] sm:$0xff]  ;;  %v4946_v32 = vld [vmem:[#allocation16_spill] sm:$0xff] }
 0x1f0   :  { %v4947_v7 = vmax.f32 %v4945_v17, %v4946_v32 }
 0x1f1   :  { %v2036_v46 = vmax.f32 %v1993_v18, 0.0  ;;  %v1944_v45 = vmax.f32 %v4932_v44, %v1901_v27 }
 0x1f2   :  { %v1300_v1 = vpop.f32.mrb[140].mxu0  ;;  %v1753_v2 = vpop.f32.mrb[140].mxu1 }
 0x1f3   :  { %2080 = vst.msk [vmem:[%s4824_s3 + $0xc8] sm:$0xff] %vm2054_vm5, %v2036_v46  ;;  %v1994_v56 = vadd.f32 %v4476_v19, %v1944_v45  ;;  %v1902_v40 = vmax.f32 %v1300_v1, %v1753_v2  ;;  %v2942_v41 = vpop.f32.mrb[141].mxu0  ;;  %v3075_v48 = vpop.f32.mrb[141].mxu1  ;;  %v4948_v45 = vld [vmem:[#allocation17_spill] sm:$0xff]  ;;  %v4949_v1 = vld [vmem:[#allocation18_spill] sm:$0xff] }
 0x1f4   :  { %v4950_v2 = vmax.f32 %v4948_v45, %v4949_v1 }
 0x1f5   :  { %v2037_v49 = vmax.f32 %v1994_v56, 0.0  ;;  %v1945_v52 = vmax.f32 %v4935_v51, %v1902_v40 }
 0x1f6   :  { %v1305_v54 = vpop.f32.mrb[142].mxu0  ;;  %v1758_v55 = vpop.f32.mrb[142].mxu1 }
 0x1f7   :  { %2081 = vst.msk [vmem:[%s4824_s3 + $0xd0] sm:$0xff] %vm2054_vm5, %v2037_v49  ;;  %v1995_v3 = vadd.f32 %v4476_v19, %v1945_v52  ;;  %v1903_v26 = vmax.f32 %v1305_v54, %v1758_v55  ;;  %v2945_v47 = vpop.f32.mrb[143].mxu0  ;;  %v3078_v50 = vpop.f32.mrb[143].mxu1  ;;  %v4951_v52 = vld [vmem:[#allocation19_spill] sm:$0xff]  ;;  %v4952_v54 = vld [vmem:[#allocation20_spill] sm:$0xff] }
 0x1f8   :  { %v4953_v55 = vmax.f32 %v4951_v52, %v4952_v54 }
 0x1f9   :  { %v2038_v57 = vmax.f32 %v1995_v3, 0.0  ;;  %v1946_v9 = vmax.f32 %v4938_v53, %v1903_v26 }
 0x1fa   :  { %v1310_v30 = vpop.f32.mrb[144].mxu0  ;;  %v1763_v21 = vpop.f32.mrb[144].mxu1 }
 0x1fb   :  { %2082 = vst.msk [vmem:[%s4824_s3 + $0xd8] sm:$0xff] %vm2054_vm5, %v2038_v57  ;;  %v1996_v36 = vadd.f32 %v4476_v19, %v1946_v9  ;;  %v1904_v31 = vmax.f32 %v1310_v30, %v1763_v21  ;;  %v2948_v0 = vpop.f32.mrb[145].mxu0  ;;  %v3081_v12 = vpop.f32.mrb[145].mxu1  ;;  %v4954_v9 = vld [vmem:[#allocation21_spill] sm:$0xff]  ;;  %v4955_v30 = vld [vmem:[#allocation22_spill] sm:$0xff] }
 0x1fc   :  { %v4956_v21 = vmax.f32 %v4954_v9, %v4955_v30 }
 0x1fd   :  { %v2039_v13 = vmax.f32 %v1996_v36, 0.0  ;;  %v1947_v22 = vmax.f32 %v4941_v20, %v1904_v31 }
 0x1fe   :  { %v1315_v61 = vpop.f32.mrb[146].mxu0  ;;  %v1768_v42 = vpop.f32.mrb[146].mxu1 }
 0x1ff   :  { %2083 = vst.msk [vmem:[%s4824_s3 + $0xe0] sm:$0xff] %vm2054_vm5, %v2039_v13  ;;  %v1997_v58 = vadd.f32 %v4476_v19, %v1947_v22  ;;  %v1905_v59 = vmax.f32 %v1315_v61, %v1768_v42  ;;  %v2951_v60 = vpop.f32.mrb[147].mxu0  ;;  %v3084_v34 = vpop.f32.mrb[147].mxu1  ;;  %v4957_v22 = vld [vmem:[#allocation23_spill] sm:$0xff]  ;;  %v4958_v61 = vld [vmem:[#allocation24_spill] sm:$0xff] }
 0x200   :  { %v4959_v42 = vmax.f32 %v4957_v22, %v4958_v61 }
 0x201   :  { %v2040_v35 = vmax.f32 %v1997_v58, 0.0  ;;  %v1948_v29 = vmax.f32 %v4944_v8, %v1905_v59 }
 0x202   :  { %v1320_v15 = vpop.f32.mrb[148].mxu0  ;;  %v1773_v37 = vpop.f32.mrb[148].mxu1 }
 0x203   :  { %2084 = vst.msk [vmem:[%s4824_s3 + $0xe8] sm:$0xff] %vm2054_vm5, %v2040_v35  ;;  %v1998_v38 = vadd.f32 %v4476_v19, %v1948_v29  ;;  %v1906_v25 = vmax.f32 %v1320_v15, %v1773_v37  ;;  %v2954_v16 = vpop.f32.mrb[149].mxu0  ;;  %v3087_v62 = vpop.f32.mrb[149].mxu1  ;;  %v4960_v29 = vld [vmem:[#allocation25_spill] sm:$0xff]  ;;  %v4961_v15 = vld [vmem:[#allocation26_spill] sm:$0xff] }
 0x204   :  { %v4962_v37 = vmax.f32 %v4960_v29, %v4961_v15 }
 0x205   :  { %v2041_v63 = vmax.f32 %v1998_v38, 0.0  ;;  %v1949_v18 = vmax.f32 %v4947_v7, %v1906_v25 }
 0x206   :  { %v1325_v27 = vpop.f32.mrb[150].mxu0  ;;  %v1778_v28 = vpop.f32.mrb[150].mxu1 }
 0x207   :  { %2085 = vst.msk [vmem:[%s4824_s3 + $0xf0] sm:$0xff] %vm2054_vm5, %v2041_v63  ;;  %v1999_v6 = vadd.f32 %v4476_v19, %v1949_v18  ;;  %v1907_v46 = vmax.f32 %v1325_v27, %v1778_v28  ;;  %v2957_v33 = vpop.f32.mrb[151].mxu0  ;;  %v3090_v43 = vpop.f32.mrb[151].mxu1  ;;  %v4963_v18 = vld [vmem:[#allocation27_spill] sm:$0xff]  ;;  %v4964_v27 = vld [vmem:[#allocation28_spill] sm:$0xff] }
 0x208   :  { %v4965_v28 = vmax.f32 %v4963_v18, %v4964_v27 }
 0x209   :  { %v2042_v44 = vmax.f32 %v1999_v6, 0.0  ;;  %v1950_v56 = vmax.f32 %v4950_v2, %v1907_v46 }
 0x20a   :  { %v1330_v40 = vpop.f32.mrb[152].mxu0  ;;  %v1783_v41 = vpop.f32.mrb[152].mxu1 }
 0x20b   :  { %2086 = vst.msk [vmem:[%s4824_s3 + $0xf8] sm:$0xff] %vm2054_vm5, %v2042_v44  ;;  %v2000_v48 = vadd.f32 %v4476_v19, %v1950_v56  ;;  %v1908_v49 = vmax.f32 %v1330_v40, %v1783_v41  ;;  %v2960_v23 = vpop.f32.mrb[153].mxu0  ;;  %v3093_v24 = vpop.f32.mrb[153].mxu1  ;;  %v4966_v56 = vld [vmem:[#allocation29_spill] sm:$0xff]  ;;  %v4967_v40 = vld [vmem:[#allocation30_spill] sm:$0xff] }
 0x20c   :  { %v4968_v41 = vmax.f32 %v4966_v56, %v4967_v40 }
 0x20d   :  { %v2043_v51 = vmax.f32 %v2000_v48, 0.0  ;;  %v1951_v3 = vmax.f32 %v4953_v55, %v1908_v49 }
 0x20e   :  { %v1335_v26 = vpop.f32.mrb[154].mxu0  ;;  %v1788_v47 = vpop.f32.mrb[154].mxu1 }
 0x20f   :  { %2087 = vst.msk [vmem:[%s4824_s3 + $0x100] sm:$0xff] %vm2054_vm5, %v2043_v51  ;;  %v2001_v50 = vadd.f32 %v4476_v19, %v1951_v3  ;;  %v1909_v57 = vmax.f32 %v1335_v26, %v1788_v47  ;;  %v2963_v39 = vpop.f32.mrb[155].mxu0  ;;  %v3096_v11 = vpop.f32.mrb[155].mxu1  ;;  %v4969_v3 = vld [vmem:[#allocation31_spill] sm:$0xff]  ;;  %v4970_v26 = vld [vmem:[#allocation32_spill] sm:$0xff] }
 0x210   :  { %v4971_v47 = vmax.f32 %v4969_v3, %v4970_v26 }
 0x211   :  { %v2044_v53 = vmax.f32 %v2001_v50, 0.0  ;;  %v1952_v36 = vmax.f32 %v4956_v21, %v1909_v57 }
 0x212   :  { %v1340_v31 = vpop.f32.mrb[156].mxu0  ;;  %v1793_v0 = vpop.f32.mrb[156].mxu1 }
 0x213   :  { %2088 = vst.msk [vmem:[%s4824_s3 + $0x108] sm:$0xff] %vm2054_vm5, %v2044_v53  ;;  %v2002_v12 = vadd.f32 %v4476_v19, %v1952_v36  ;;  %v1910_v13 = vmax.f32 %v1340_v31, %v1793_v0  ;;  %v2966_v4 = vpop.f32.mrb[157].mxu0  ;;  %v3099_v10 = vpop.f32.mrb[157].mxu1  ;;  %v4972_v36 = vld [vmem:[#allocation33_spill] sm:$0xff]  ;;  %v4973_v31 = vld [vmem:[#allocation34_spill] sm:$0xff] }
 0x214   :  { %v4974_v0 = vmax.f32 %v4972_v36, %v4973_v31 }
 0x215   :  { %v2045_v20 = vmax.f32 %v2002_v12, 0.0  ;;  %v1953_v58 = vmax.f32 %v4959_v42, %v1910_v13 }
 0x216   :  { %v1345_v59 = vpop.f32.mrb[158].mxu0  ;;  %v1798_v60 = vpop.f32.mrb[158].mxu1 }
 0x217   :  { %2089 = vst.msk [vmem:[%s4824_s3 + $0x110] sm:$0xff] %vm2054_vm5, %v2045_v20  ;;  %v2003_v34 = vadd.f32 %v4476_v19, %v1953_v58  ;;  %v1911_v35 = vmax.f32 %v1345_v59, %v1798_v60  ;;  %v2969_v5 = vpop.f32.mrb[159].mxu0  ;;  %v3102_v14 = vpop.f32.mrb[159].mxu1  ;;  %v4975_v58 = vld [vmem:[#allocation35_spill] sm:$0xff]  ;;  %v4976_v59 = vld [vmem:[#allocation36_spill] sm:$0xff] }
 0x218   :  { %v4977_v60 = vmax.f32 %v4975_v58, %v4976_v59 }
 0x219   :  { %v2046_v8 = vmax.f32 %v2003_v34, 0.0  ;;  %v1954_v38 = vmax.f32 %v4962_v37, %v1911_v35 }
 0x21a   :  { %v1350_v25 = vpop.f32.mrb[160].mxu0  ;;  %v1803_v16 = vpop.f32.mrb[160].mxu1 }
 0x21b   :  { %2090 = vst.msk [vmem:[%s4824_s3 + $0x118] sm:$0xff] %vm2054_vm5, %v2046_v8  ;;  %v2004_v62 = vadd.f32 %v4476_v19, %v1954_v38  ;;  %v1912_v63 = vmax.f32 %v1350_v25, %v1803_v16  ;;  %v2972_v17 = vpop.f32.mrb[161].mxu0  ;;  %v3105_v32 = vpop.f32.mrb[161].mxu1  ;;  %v4978_v38 = vld [vmem:[#allocation37_spill] sm:$0xff]  ;;  %v4979_v25 = vld [vmem:[#allocation38_spill] sm:$0xff] }
 0x21c   :  { %v4980_v16 = vmax.f32 %v4978_v38, %v4979_v25 }
 0x21d   :  { %v2047_v7 = vmax.f32 %v2004_v62, 0.0  ;;  %v1955_v6 = vmax.f32 %v4965_v28, %v1912_v63 }
 0x21e   :  { %v1355_v46 = vpop.f32.mrb[162].mxu0  ;;  %v1808_v33 = vpop.f32.mrb[162].mxu1 }
 0x21f   :  { %2091 = vst.msk [vmem:[%s4824_s3 + $0x120] sm:$0xff] %vm2054_vm5, %v2047_v7  ;;  %v2005_v43 = vadd.f32 %v4476_v19, %v1955_v6  ;;  %v1913_v44 = vmax.f32 %v1355_v46, %v1808_v33  ;;  %v2975_v45 = vpop.f32.mrb[163].mxu0  ;;  %v3108_v1 = vpop.f32.mrb[163].mxu1 }
 0x221   :  { %v2048_v2 = vmax.f32 %v2005_v43, 0.0  ;;  %v1956_v48 = vmax.f32 %v4968_v41, %v1913_v44 }
 0x222   :  { %v1360_v49 = vpop.f32.mrb[164].mxu0  ;;  %v1813_v23 = vpop.f32.mrb[164].mxu1 }
 0x223   :  { %2092 = vst.msk [vmem:[%s4824_s3 + $0x128] sm:$0xff] %vm2054_vm5, %v2048_v2  ;;  %v2006_v24 = vadd.f32 %v4476_v19, %v1956_v48  ;;  %v1914_v51 = vmax.f32 %v1360_v49, %v1813_v23  ;;  %v2978_v52 = vpop.f32.mrb[165].mxu0  ;;  %v3111_v54 = vpop.f32.mrb[165].mxu1 }
 0x225   :  { %v2049_v55 = vmax.f32 %v2006_v24, 0.0  ;;  %v1957_v50 = vmax.f32 %v4971_v47, %v1914_v51 }
 0x226   :  { %v1365_v57 = vpop.f32.mrb[166].mxu0  ;;  %v1818_v39 = vpop.f32.mrb[166].mxu1 }
 0x227   :  { %2093 = vst.msk [vmem:[%s4824_s3 + $0x130] sm:$0xff] %vm2054_vm5, %v2049_v55  ;;  %v2007_v11 = vadd.f32 %v4476_v19, %v1957_v50  ;;  %v1915_v53 = vmax.f32 %v1365_v57, %v1818_v39  ;;  %v2981_v9 = vpop.f32.mrb[167].mxu0  ;;  %v3114_v30 = vpop.f32.mrb[167].mxu1 }
 0x229   :  { %v2050_v21 = vmax.f32 %v2007_v11, 0.0  ;;  %v1958_v12 = vmax.f32 %v4974_v0, %v1915_v53 }
 0x22a   :  { %v1370_v13 = vpop.f32.mrb[168].mxu0  ;;  %v1823_v4 = vpop.f32.mrb[168].mxu1 }
 0x22b   :  { %2094 = vst.msk [vmem:[%s4824_s3 + $0x138] sm:$0xff] %vm2054_vm5, %v2050_v21  ;;  %v2008_v10 = vadd.f32 %v4476_v19, %v1958_v12  ;;  %v1916_v20 = vmax.f32 %v1370_v13, %v1823_v4  ;;  %v2984_v22 = vpop.f32.mrb[169].mxu0  ;;  %v3117_v61 = vpop.f32.mrb[169].mxu1 }
 0x22d   :  { %v2051_v42 = vmax.f32 %v2008_v10, 0.0  ;;  %v1959_v34 = vmax.f32 %v4977_v60, %v1916_v20 }
 0x22e   :  { %v1375_v35 = vpop.f32.mrb[170].mxu0  ;;  %v1828_v5 = vpop.f32.mrb[170].mxu1 }
 0x22f   :  { %2095 = vst.msk [vmem:[%s4824_s3 + $0x140] sm:$0xff] %vm2054_vm5, %v2051_v42  ;;  %v2009_v14 = vadd.f32 %v4476_v19, %v1959_v34  ;;  %v1917_v8 = vmax.f32 %v1375_v35, %v1828_v5  ;;  %v2987_v29 = vpop.f32.mrb[171].mxu0  ;;  %v3120_v15 = vpop.f32.mrb[171].mxu1 }
 0x231   :  { %v2052_v37 = vmax.f32 %v2009_v14, 0.0  ;;  %v1960_v62 = vmax.f32 %v4980_v16, %v1917_v8 }
 0x233   :  { %2096 = vst.msk [vmem:[%s4824_s3 + $0x148] sm:$0xff] %vm2054_vm5, %v2052_v37  ;;  %v2010_v63 = vadd.f32 %v4476_v19, %v1960_v62 }
 0x235   :  { %v2053_v17 = vmax.f32 %v2010_v63, 0.0 }
 0x237   :  { %2098 = vst.msk [vmem:[%s4824_s3 + $0x150] sm:$0x3] %vm2097_vm6, %v2053_v17 }

</bundles_post_ra>
